<compile_context>
chip_gen: v7x
topology: tpu7x:2x2x1
jax: 0.10.0
libtpu: 0.0.40
codegen_flags: <defaults>
</compile_context>

<pallas_src>
import jax
import jax.numpy as jnp
from jax import lax
from jax.experimental import pallas as pl
from jax.experimental.pallas import tpu as pltpu


# ----------------------------- sizing helpers ---------------------------------------------

_VMEM_FIT_BUDGET = 40 * 2**20   # keep the working set well under v7x's 64 MiB physical VMEM


def _round_up(x, m):
    return ((x + m - 1) // m) * m


def _mxu_lane_target():
    """Target group lane width: 256 on v6e/v7x (256-wide MXU), 128 on v5e and older."""
    try:
        kind = jax.devices()[0].device_kind.lower()
    except Exception:
        return 256
    for old in ("v2", "v3", "v4", "v5"):
        if old in kind:
            return 128
    return 256


def _pick_book_tile(n_books, l_word, target_width):
    """Smallest divisor bt of n_books with (bt*l_word) % target == 0; fall back to 128, else all books."""
    for width in (target_width, 128):
        for bt in range(1, n_books + 1):
            if n_books % bt == 0 and (bt * l_word) % width == 0:
                return bt
    return n_books  # block width == full feature dim -> still a legal (full-extent) block


def _vmem_bytes_estimate(tile_n, width, bt, n_words):
    """Rough VMEM footprint: pipelined blocks (x2 buffers), scratch, live intermediates."""
    f32 = 4
    x_blk = 2 * tile_n * width * f32
    z_blk = 2 * tile_n * width * f32
    c_blk = 2 * bt * n_words * width * f32
    i_blk = 2 * tile_n * bt * 4
    scratch = 2 * bt * n_words * width * f32          # cn + cn^T
    interm = 3 * tile_n * bt * n_words * f32          # logits / exp / soft live values
    return x_blk + z_blk + c_blk + i_blk + scratch + interm


def _pick_tile_n(n_images, width, bt, n_words):
    """Image tile: fill the MXU M dim / amortize step overhead, but stay inside the VMEM budget."""
    tile = 512 if n_images >= 512 else _round_up(max(n_images, 1), 8)
    while tile > 8 and _vmem_bytes_estimate(tile, width, bt, n_words) > _VMEM_FIT_BUDGET:
        tile = max(8, _round_up(tile // 2, 8))
    return tile


# ----------------------------- kernel ------------------------------------------------------

def _make_soft_pq_kernel(tau_q: float, n_words: int, book_tile: int):
    tau_q = float(tau_q)

    def kernel(x_ref, c_ref, z_ref, idx_ref, cn_ref, cnt_ref):
        # ---- per-group, loop-invariant prep (runs once per group, at image tile j == 0) ----
        # The image axis is "arbitrary" (not megacore-sharded), so j == 0 runs before every
        # other image tile of this group on the same core; the VMEM scratch persists across
        # grid steps, so the normalization / transpose is NOT recomputed per image tile.
        @pl.when(pl.program_id(1) == 0)
        def _prep():
            cb = c_ref[0]                                   # (BT*N_words, width), block-diagonal
            # Each block-diag row holds exactly one codeword -> one row-wise rsqrt normalizes
            # every book's codewords at once (matches F.normalize(c, dim=1), eps=1e-12).
            sq = jnp.sum(cb * cb, axis=1, keepdims=True)
            cn = cb * lax.rsqrt(jnp.maximum(sq, 1e-24))
            cn_ref[...] = cn.astype(cn_ref.dtype)
            # Transposed copy for the score matmul (standard A@B form -> no per-step vxpose),
            # with the 2*tau_q logits scale folded in (saves a full-matrix multiply per step).
            cnt_ref[...] = ((2.0 * tau_q) * cn).T.astype(cnt_ref.dtype)

        cn = cn_ref[...]                                    # (BT*N_words, width)
        cnt = cnt_ref[...]                                  # (width, BT*N_words), pre-scaled
        x = x_ref[...].astype(cnt.dtype)                    # (TILE_N, width)

        # logits = 2*tau_q*<x, c_n> for every book of the group with ONE MXU matmul.
        # softmax(-tau_q*dist) == softmax(2*tau_q*<x,c>) per book: the ||x||^2 row constant
        # and the ||c_n||^2 == 1 column constant drop out of both the softmax and the argmin.
        logits = jnp.dot(x, cnt, preferred_element_type=jnp.float32)   # (TILE_N, BT*N_words)

        # Hoisted iota (JAX does not CSE broadcast_in_dim; keep one copy, not BT copies).
        col = lax.broadcasted_iota(jnp.int32, (logits.shape[0], n_words), 1)

        p_parts, idx_parts = [], []
        for k in range(book_tile):                          # small static unrolled loop over books
            seg = logits[:, k * n_words:(k + 1) * n_words]  # (TILE_N, N_words)
            m = jnp.max(seg, axis=-1, keepdims=True)
            p = jnp.exp(seg - m)
            s = jnp.sum(p, axis=-1, keepdims=True)
            # EUP approximate reciprocal touches only the (TILE_N, 1) denominator column.
            p_parts.append(p * pl.reciprocal(s, approx=True))
            # argmin(dist) == argmax(logits); reuse the softmax row max, first occurrence wins.
            idx_parts.append(jnp.min(jnp.where(seg >= m, col, n_words),
                                     axis=-1, keepdims=True))

        soft = jnp.concatenate(p_parts, axis=-1).astype(cn.dtype)       # (TILE_N, BT*N_words)
        # Block-diagonal cn routes each book's soft weights to its own L_word columns, so the
        # Z slab lands packed, lane-dense, directly in the final (N_images, D) layout.
        z_ref[...] = jnp.dot(soft, cn,
                             preferred_element_type=jnp.float32).astype(z_ref.dtype)
        idx_ref[0] = jnp.concatenate(idx_parts, axis=-1).astype(jnp.int32)

    return kernel


# ----------------------------- wrapper ------------------------------------------------------

def soft_pq_forward(X, C, N_books, tau_q, *, tile_n=None, matmul_dtype=jnp.float32):
    """X: (N_images, N_books*L_word), C: (N_words, N_books*L_word).
    Returns (Z, idx): Z (N_images, N_books*L_word) float32, idx (N_images, N_books) int32.

    matmul_dtype=jnp.bfloat16 gives ~3x MXU throughput (f32 accumulation kept) at the cost of
    ~1e-3 Z accuracy and possible argmin tie shifts; default f32 matches the reference.
    """
    N_images, D = X.shape
    N_words = C.shape[0]
    L_word = D // N_books

    BT = _pick_book_tile(N_books, L_word, _mxu_lane_target())
    N_groups = N_books // BT
    width = BT * L_word

    # Image tiling: pad ragged batches to a multiple of TILE_N (no tiny-tile / huge-block fallback).
    if tile_n is None:
        tile_n = _pick_tile_n(N_images, width, BT, N_words)
    TILE_N = max(8, _round_up(int(tile_n), 8))
    N_pad = _round_up(max(N_images, 1), TILE_N)
    X_in = X if N_pad == N_images else jnp.pad(X, ((0, N_pad - N_images), (0, 0)))

    # Tiny wrapper-side layout step: per-group block-diagonal codebook (pure data movement on
    # the small C tensor; the normalization math itself stays in the kernel).
    Cg = C.reshape(N_words, N_groups, BT, L_word).transpose(1, 2, 0, 3)     # (G, BT, W, L)
    eye = jnp.eye(BT, dtype=C.dtype)
    Cb = jnp.einsum('gkwl,kt->gkwtl', Cg, eye).reshape(N_groups, BT * N_words, width)

    # VMEM limit computed from the actual block/scratch/intermediate sizes (clamped for v7x).
    # TODO(synk): configs with a very large N_words*width block-diag codebook (>~40 MiB) would
    # additionally need codeword-axis tiling; not required for the module's default sizes.
    vmem_est = _vmem_bytes_estimate(TILE_N, width, BT, N_words)
    vmem_limit = int(min(max(vmem_est * 3 // 2, 32 * 2**20), 56 * 2**20))

    kernel = _make_soft_pq_kernel(tau_q, N_words, BT)

    Z, idx3 = pl.pallas_call(
        kernel,
        out_shape=(
            jax.ShapeDtypeStruct((N_pad, D), jnp.float32),
            jax.ShapeDtypeStruct((N_groups, N_pad, BT), jnp.int32),
        ),
        grid_spec=pltpu.PrefetchScalarGridSpec(
            num_scalar_prefetch=0,
            grid=(N_groups, N_pad // TILE_N),           # image axis inner: C block not re-DMA'd
            in_specs=[
                pl.BlockSpec((TILE_N, width), lambda g, j: (j, g)),               # X (direct layout)
                pl.BlockSpec((1, BT * N_words, width), lambda g, j: (g, 0, 0)),   # block-diag C
            ],
            out_specs=[
                pl.BlockSpec((TILE_N, width), lambda g, j: (j, g)),               # Z (final layout)
                pl.BlockSpec((1, TILE_N, BT), lambda g, j: (g, j, 0)),            # idx
            ],
            scratch_shapes=[
                pltpu.VMEM((BT * N_words, width), matmul_dtype),   # normalized block-diag codebook
                pltpu.VMEM((width, BT * N_words), matmul_dtype),   # its transpose, pre-scaled by 2*tau_q
            ],
        ),
        compiler_params=pltpu.CompilerParams(
            # Group axis megacore-sharded; image axis "arbitrary" so the j==0 prep into the
            # persistent scratch is guaranteed to run first on every core.
            dimension_semantics=("parallel", "arbitrary"),
            vmem_limit_bytes=vmem_limit,
        ),
    )(X_in, Cb)

    idx = jnp.transpose(idx3, (1, 0, 2)).reshape(N_pad, N_books)[:N_images]   # tiny int32 glue
    return Z[:N_images], idx


# ----------------------------- pure-JAX reference ------------------------------------------

def soft_pq_reference(X, C, N_books, tau_q):
    """Pure-JAX mirror of the PyTorch forward (for verification)."""
    N_images, D = X.shape
    L_word = D // N_books
    Zs, idxs = [], []
    for i in range(N_books):
        x_i = X[:, i * L_word:(i + 1) * L_word]
        c_i = C[:, i * L_word:(i + 1) * L_word]
        c_i = c_i / jnp.maximum(jnp.linalg.norm(c_i, axis=1, keepdims=True), 1e-12)
        diff = x_i[:, None, :] - c_i[None, :, :]
        dist = jnp.sum(diff * diff, axis=-1)
        soft = jax.nn.softmax(-tau_q * dist, axis=-1)
        Zs.append(soft @ c_i)
        idxs.append(jnp.argmin(dist, axis=1)[:, None])
    return jnp.concatenate(Zs, axis=1), jnp.concatenate(idxs, axis=1)


if __name__ == "__main__":
    # Small shapes consistent with the module (N_words / N_books scaled down, L_word kept at 32).
    N_images, N_words, N_books, L_word, tau_q = 10, 16, 8, 32, 10.0

    key = jax.random.PRNGKey(0)
    k_c, k_x = jax.random.split(key)

    # Deterministic parameter init matching nn.init.xavier_normal_(C, gain=0.1):
    #   std = gain * sqrt(2 / (fan_in + fan_out)), fan_in = N_books*L_word, fan_out = N_words.
    fan_in, fan_out = N_books * L_word, N_words
    std = 0.1 * (2.0 / (fan_in + fan_out)) ** 0.5
    C = std * jax.random.normal(k_c, (N_words, N_books * L_word), dtype=jnp.float32)
    X = jax.random.normal(k_x, (N_images, N_books * L_word), dtype=jnp.float32)

    # tile_n=8 forces the ragged-batch padding path (10 -> 16) and two image tiles per group,
    # exercising the per-group pl.when prep + persistent VMEM scratch reuse.
    Z, idx = soft_pq_forward(X, C, N_books, tau_q, tile_n=8)
    Z = jax.block_until_ready(Z)
    idx = jax.block_until_ready(idx)

    Z_ref, idx_ref = soft_pq_reference(X, C, N_books, tau_q)
    assert Z.shape == (N_images, N_books * L_word)
    assert idx.shape == (N_images, N_books)
    # Tolerance accounts for the EUP approximate reciprocal in the softmax normalization
    # (set approx=False in the kernel to recover ~1e-5 agreement).
    assert jnp.allclose(Z, Z_ref, atol=2e-3, rtol=2e-3), "Z mismatch"
    assert jnp.array_equal(idx.astype(jnp.int32), idx_ref.astype(jnp.int32)), "idx mismatch"

    print("KERNEL_OK")
</pallas_src>

<mosaic_0001>
module attributes {stable_mosaic.version = 11 : i64} {
  func.func @kernel(%arg0: i32, %arg1: i32, %arg2: memref<8x256xf32, #tpu.memory_space<vmem>>, %arg3: memref<1x128x256xf32, #tpu.memory_space<vmem>>, %arg4: memref<8x256xf32, #tpu.memory_space<vmem>>, %arg5: memref<1x8x8xi32, #tpu.memory_space<vmem>>, %arg6: memref<128x256xf32, #tpu.memory_space<vmem>>, %arg7: memref<256x128xf32, #tpu.memory_space<vmem>>) attributes {dimension_semantics = [#tpu.dimension_semantics<parallel>, #tpu.dimension_semantics<arbitrary>], iteration_bounds = array<i64: 1, 2>, scalar_prefetch = 0 : i64, scratch_operands = 2 : i64, tpu.core_type = #tpu.core_type<tc>, window_params = [{transform_indices = @transform_0, window_bounds = array<i64: 8, 256>}, {transform_indices = @transform_1, window_bounds = array<i64: 1, 128, 256>}, {transform_indices = @transform_2, window_bounds = array<i64: 8, 256>}, {transform_indices = @transform_3, window_bounds = array<i64: 1, 8, 8>}]} {
    %c0_i32 = arith.constant 0 : i32
    %0 = arith.cmpi eq, %arg1, %c0_i32 : i32
    %1 = arith.extui %0 : i1 to i32
    %c0_i32_0 = arith.constant 0 : i32
    %2 = arith.cmpi ne, %1, %c0_i32_0 : i32
    scf.if %2 {
      %c0_43 = arith.constant 0 : index
      %c0_44 = arith.constant 0 : index
      %c0_45 = arith.constant 0 : index
      %151 = vector.load %arg3[%c0_43, %c0_44, %c0_45] : memref<1x128x256xf32, #tpu.memory_space<vmem>>, vector<1x128x256xf32>
      %152 = vector.shape_cast %151 : vector<1x128x256xf32> to vector<128x256xf32>
      %153 = arith.mulf %152, %152 : vector<128x256xf32>
      %cst_46 = arith.constant dense<0.000000e+00> : vector<128xf32>
      %154 = vector.multi_reduction <add>, %153, %cst_46 [1] : vector<128x256xf32> to vector<128xf32>
      %155 = vector.shape_cast %154 : vector<128xf32> to vector<128x1xf32>
      %cst_47 = arith.constant 1.000000e-24 : f32
      %156 = vector.broadcast %cst_47 : f32 to vector<128x1xf32>
      %157 = arith.maximumf %155, %156 : vector<128x1xf32>
      %158 = math.rsqrt %157 : vector<128x1xf32>
      %159 = vector.broadcast %158 : vector<128x1xf32> to vector<128x256xf32>
      %160 = arith.mulf %152, %159 : vector<128x256xf32>
      %c0_48 = arith.constant 0 : index
      %c0_49 = arith.constant 0 : index
      %161 = vector.load %arg6[%c0_48, %c0_49] : memref<128x256xf32, #tpu.memory_space<vmem>>, vector<128x256xf32>
      tpu.vector_store %arg6[%c0_48, %c0_49], %160 {strides = array<i32>} : memref<128x256xf32, #tpu.memory_space<vmem>>, vector<128x256xf32>,
      %cst_50 = arith.constant 2.000000e+01 : f32
      %162 = vector.broadcast %cst_50 : f32 to vector<128x256xf32>
      %163 = arith.mulf %162, %160 : vector<128x256xf32>
      %164 = tpu.transpose %163, [1, 0] : vector<128x256xf32> -> vector<256x128xf32>
      %c0_51 = arith.constant 0 : index
      %c0_52 = arith.constant 0 : index
      %165 = vector.load %arg7[%c0_51, %c0_52] : memref<256x128xf32, #tpu.memory_space<vmem>>, vector<256x128xf32>
      tpu.vector_store %arg7[%c0_51, %c0_52], %164 {strides = array<i32>} : memref<256x128xf32, #tpu.memory_space<vmem>>, vector<256x128xf32>,
    } else {
    }
    %c0 = arith.constant 0 : index
    %c0_1 = arith.constant 0 : index
    %3 = vector.load %arg6[%c0, %c0_1] : memref<128x256xf32, #tpu.memory_space<vmem>>, vector<128x256xf32>
    %c0_2 = arith.constant 0 : index
    %c0_3 = arith.constant 0 : index
    %4 = vector.load %arg7[%c0_2, %c0_3] : memref<256x128xf32, #tpu.memory_space<vmem>>, vector<256x128xf32>
    %c0_4 = arith.constant 0 : index
    %c0_5 = arith.constant 0 : index
    %5 = vector.load %arg2[%c0_4, %c0_5] : memref<8x256xf32, #tpu.memory_space<vmem>>, vector<8x256xf32>
    %cst = arith.constant dense<0.000000e+00> : vector<8x128xf32>
    %6 = tpu.matmul %5, %4, %cst {dimension_numbers = #tpu.dot_dimension_numbers<[1], [0], [0], [1], [0, 0, 1, 1], [], []>} : vector<8x256xf32>, vector<256x128xf32>, vector<8x128xf32> -> vector<8x128xf32>
    %7 = tpu.iota {dimensions = array<i32: 1>} : vector<8x16xi32>
    %8 = vector.extract_strided_slice %6 {offsets = [0, 0], sizes = [8, 16], strides = [1, 1]} : vector<8x128xf32> to vector<8x16xf32>
    %cst_6 = arith.constant dense<0xFF800000> : vector<8xf32>
    %9 = vector.multi_reduction <maximumf>, %8, %cst_6 [1] : vector<8x16xf32> to vector<8xf32>
    %10 = vector.shape_cast %9 : vector<8xf32> to vector<8x1xf32>
    %11 = vector.broadcast %10 : vector<8x1xf32> to vector<8x16xf32>
    %12 = arith.subf %8, %11 : vector<8x16xf32>
    %13 = math.exp %12 : vector<8x16xf32>
    %cst_7 = arith.constant dense<0.000000e+00> : vector<8xf32>
    %14 = vector.multi_reduction <add>, %13, %cst_7 [1] : vector<8x16xf32> to vector<8xf32>
    %15 = vector.shape_cast %14 : vector<8xf32> to vector<8x1xf32>
    %16 = tpu.reciprocal %15 {approx = true} : vector<8x1xf32> -> vector<8x1xf32>
    %17 = vector.broadcast %16 : vector<8x1xf32> to vector<8x16xf32>
    %18 = arith.mulf %13, %17 : vector<8x16xf32>
    %19 = vector.broadcast %10 : vector<8x1xf32> to vector<8x16xf32>
    %20 = arith.cmpf oge, %8, %19 : vector<8x16xf32>
    %c16_i32 = arith.constant 16 : i32
    %21 = vector.broadcast %c16_i32 : i32 to vector<8x16xi32>
    %22 = arith.select %20, %7, %21 : vector<8x16xi1>, vector<8x16xi32>
    %cst_8 = arith.constant dense<2147483647> : vector<8xi32>
    %23 = vector.multi_reduction <minsi>, %22, %cst_8 [1] : vector<8x16xi32> to vector<8xi32>
    %24 = vector.shape_cast %23 : vector<8xi32> to vector<8x1xi32>
    %25 = vector.extract_strided_slice %6 {offsets = [0, 16], sizes = [8, 16], strides = [1, 1]} : vector<8x128xf32> to vector<8x16xf32>
    %cst_9 = arith.constant dense<0xFF800000> : vector<8xf32>
    %26 = vector.multi_reduction <maximumf>, %25, %cst_9 [1] : vector<8x16xf32> to vector<8xf32>
    %27 = vector.shape_cast %26 : vector<8xf32> to vector<8x1xf32>
    %28 = vector.broadcast %27 : vector<8x1xf32> to vector<8x16xf32>
    %29 = arith.subf %25, %28 : vector<8x16xf32>
    %30 = math.exp %29 : vector<8x16xf32>
    %cst_10 = arith.constant dense<0.000000e+00> : vector<8xf32>
    %31 = vector.multi_reduction <add>, %30, %cst_10 [1] : vector<8x16xf32> to vector<8xf32>
    %32 = vector.shape_cast %31 : vector<8xf32> to vector<8x1xf32>
    %33 = tpu.reciprocal %32 {approx = true} : vector<8x1xf32> -> vector<8x1xf32>
    %34 = vector.broadcast %33 : vector<8x1xf32> to vector<8x16xf32>
    %35 = arith.mulf %30, %34 : vector<8x16xf32>
    %36 = vector.broadcast %27 : vector<8x1xf32> to vector<8x16xf32>
    %37 = arith.cmpf oge, %25, %36 : vector<8x16xf32>
    %c16_i32_11 = arith.constant 16 : i32
    %38 = vector.broadcast %c16_i32_11 : i32 to vector<8x16xi32>
    %39 = arith.select %37, %7, %38 : vector<8x16xi1>, vector<8x16xi32>
    %cst_12 = arith.constant dense<2147483647> : vector<8xi32>
    %40 = vector.multi_reduction <minsi>, %39, %cst_12 [1] : vector<8x16xi32> to vector<8xi32>
    %41 = vector.shape_cast %40 : vector<8xi32> to vector<8x1xi32>
    %42 = vector.extract_strided_slice %6 {offsets = [0, 32], sizes = [8, 16], strides = [1, 1]} : vector<8x128xf32> to vector<8x16xf32>
    %cst_13 = arith.constant dense<0xFF800000> : vector<8xf32>
    %43 = vector.multi_reduction <maximumf>, %42, %cst_13 [1] : vector<8x16xf32> to vector<8xf32>
    %44 = vector.shape_cast %43 : vector<8xf32> to vector<8x1xf32>
    %45 = vector.broadcast %44 : vector<8x1xf32> to vector<8x16xf32>
    %46 = arith.subf %42, %45 : vector<8x16xf32>
    %47 = math.exp %46 : vector<8x16xf32>
    %cst_14 = arith.constant dense<0.000000e+00> : vector<8xf32>
    %48 = vector.multi_reduction <add>, %47, %cst_14 [1] : vector<8x16xf32> to vector<8xf32>
    %49 = vector.shape_cast %48 : vector<8xf32> to vector<8x1xf32>
    %50 = tpu.reciprocal %49 {approx = true} : vector<8x1xf32> -> vector<8x1xf32>
    %51 = vector.broadcast %50 : vector<8x1xf32> to vector<8x16xf32>
    %52 = arith.mulf %47, %51 : vector<8x16xf32>
    %53 = vector.broadcast %44 : vector<8x1xf32> to vector<8x16xf32>
    %54 = arith.cmpf oge, %42, %53 : vector<8x16xf32>
    %c16_i32_15 = arith.constant 16 : i32
    %55 = vector.broadcast %c16_i32_15 : i32 to vector<8x16xi32>
    %56 = arith.select %54, %7, %55 : vector<8x16xi1>, vector<8x16xi32>
    %cst_16 = arith.constant dense<2147483647> : vector<8xi32>
    %57 = vector.multi_reduction <minsi>, %56, %cst_16 [1] : vector<8x16xi32> to vector<8xi32>
    %58 = vector.shape_cast %57 : vector<8xi32> to vector<8x1xi32>
    %59 = vector.extract_strided_slice %6 {offsets = [0, 48], sizes = [8, 16], strides = [1, 1]} : vector<8x128xf32> to vector<8x16xf32>
    %cst_17 = arith.constant dense<0xFF800000> : vector<8xf32>
    %60 = vector.multi_reduction <maximumf>, %59, %cst_17 [1] : vector<8x16xf32> to vector<8xf32>
    %61 = vector.shape_cast %60 : vector<8xf32> to vector<8x1xf32>
    %62 = vector.broadcast %61 : vector<8x1xf32> to vector<8x16xf32>
    %63 = arith.subf %59, %62 : vector<8x16xf32>
    %64 = math.exp %63 : vector<8x16xf32>
    %cst_18 = arith.constant dense<0.000000e+00> : vector<8xf32>
    %65 = vector.multi_reduction <add>, %64, %cst_18 [1] : vector<8x16xf32> to vector<8xf32>
    %66 = vector.shape_cast %65 : vector<8xf32> to vector<8x1xf32>
    %67 = tpu.reciprocal %66 {approx = true} : vector<8x1xf32> -> vector<8x1xf32>
    %68 = vector.broadcast %67 : vector<8x1xf32> to vector<8x16xf32>
    %69 = arith.mulf %64, %68 : vector<8x16xf32>
    %70 = vector.broadcast %61 : vector<8x1xf32> to vector<8x16xf32>
    %71 = arith.cmpf oge, %59, %70 : vector<8x16xf32>
    %c16_i32_19 = arith.constant 16 : i32
    %72 = vector.broadcast %c16_i32_19 : i32 to vector<8x16xi32>
    %73 = arith.select %71, %7, %72 : vector<8x16xi1>, vector<8x16xi32>
    %cst_20 = arith.constant dense<2147483647> : vector<8xi32>
    %74 = vector.multi_reduction <minsi>, %73, %cst_20 [1] : vector<8x16xi32> to vector<8xi32>
    %75 = vector.shape_cast %74 : vector<8xi32> to vector<8x1xi32>
    %76 = vector.extract_strided_slice %6 {offsets = [0, 64], sizes = [8, 16], strides = [1, 1]} : vector<8x128xf32> to vector<8x16xf32>
    %cst_21 = arith.constant dense<0xFF800000> : vector<8xf32>
    %77 = vector.multi_reduction <maximumf>, %76, %cst_21 [1] : vector<8x16xf32> to vector<8xf32>
    %78 = vector.shape_cast %77 : vector<8xf32> to vector<8x1xf32>
    %79 = vector.broadcast %78 : vector<8x1xf32> to vector<8x16xf32>
    %80 = arith.subf %76, %79 : vector<8x16xf32>
    %81 = math.exp %80 : vector<8x16xf32>
    %cst_22 = arith.constant dense<0.000000e+00> : vector<8xf32>
    %82 = vector.multi_reduction <add>, %81, %cst_22 [1] : vector<8x16xf32> to vector<8xf32>
    %83 = vector.shape_cast %82 : vector<8xf32> to vector<8x1xf32>
    %84 = tpu.reciprocal %83 {approx = true} : vector<8x1xf32> -> vector<8x1xf32>
    %85 = vector.broadcast %84 : vector<8x1xf32> to vector<8x16xf32>
    %86 = arith.mulf %81, %85 : vector<8x16xf32>
    %87 = vector.broadcast %78 : vector<8x1xf32> to vector<8x16xf32>
    %88 = arith.cmpf oge, %76, %87 : vector<8x16xf32>
    %c16_i32_23 = arith.constant 16 : i32
    %89 = vector.broadcast %c16_i32_23 : i32 to vector<8x16xi32>
    %90 = arith.select %88, %7, %89 : vector<8x16xi1>, vector<8x16xi32>
    %cst_24 = arith.constant dense<2147483647> : vector<8xi32>
    %91 = vector.multi_reduction <minsi>, %90, %cst_24 [1] : vector<8x16xi32> to vector<8xi32>
    %92 = vector.shape_cast %91 : vector<8xi32> to vector<8x1xi32>
    %93 = vector.extract_strided_slice %6 {offsets = [0, 80], sizes = [8, 16], strides = [1, 1]} : vector<8x128xf32> to vector<8x16xf32>
    %cst_25 = arith.constant dense<0xFF800000> : vector<8xf32>
    %94 = vector.multi_reduction <maximumf>, %93, %cst_25 [1] : vector<8x16xf32> to vector<8xf32>
    %95 = vector.shape_cast %94 : vector<8xf32> to vector<8x1xf32>
    %96 = vector.broadcast %95 : vector<8x1xf32> to vector<8x16xf32>
    %97 = arith.subf %93, %96 : vector<8x16xf32>
    %98 = math.exp %97 : vector<8x16xf32>
    %cst_26 = arith.constant dense<0.000000e+00> : vector<8xf32>
    %99 = vector.multi_reduction <add>, %98, %cst_26 [1] : vector<8x16xf32> to vector<8xf32>
    %100 = vector.shape_cast %99 : vector<8xf32> to vector<8x1xf32>
    %101 = tpu.reciprocal %100 {approx = true} : vector<8x1xf32> -> vector<8x1xf32>
    %102 = vector.broadcast %101 : vector<8x1xf32> to vector<8x16xf32>
    %103 = arith.mulf %98, %102 : vector<8x16xf32>
    %104 = vector.broadcast %95 : vector<8x1xf32> to vector<8x16xf32>
    %105 = arith.cmpf oge, %93, %104 : vector<8x16xf32>
    %c16_i32_27 = arith.constant 16 : i32
    %106 = vector.broadcast %c16_i32_27 : i32 to vector<8x16xi32>
    %107 = arith.select %105, %7, %106 : vector<8x16xi1>, vector<8x16xi32>
    %cst_28 = arith.constant dense<2147483647> : vector<8xi32>
    %108 = vector.multi_reduction <minsi>, %107, %cst_28 [1] : vector<8x16xi32> to vector<8xi32>
    %109 = vector.shape_cast %108 : vector<8xi32> to vector<8x1xi32>
    %110 = vector.extract_strided_slice %6 {offsets = [0, 96], sizes = [8, 16], strides = [1, 1]} : vector<8x128xf32> to vector<8x16xf32>
    %cst_29 = arith.constant dense<0xFF800000> : vector<8xf32>
    %111 = vector.multi_reduction <maximumf>, %110, %cst_29 [1] : vector<8x16xf32> to vector<8xf32>
    %112 = vector.shape_cast %111 : vector<8xf32> to vector<8x1xf32>
    %113 = vector.broadcast %112 : vector<8x1xf32> to vector<8x16xf32>
    %114 = arith.subf %110, %113 : vector<8x16xf32>
    %115 = math.exp %114 : vector<8x16xf32>
    %cst_30 = arith.constant dense<0.000000e+00> : vector<8xf32>
    %116 = vector.multi_reduction <add>, %115, %cst_30 [1] : vector<8x16xf32> to vector<8xf32>
    %117 = vector.shape_cast %116 : vector<8xf32> to vector<8x1xf32>
    %118 = tpu.reciprocal %117 {approx = true} : vector<8x1xf32> -> vector<8x1xf32>
    %119 = vector.broadcast %118 : vector<8x1xf32> to vector<8x16xf32>
    %120 = arith.mulf %115, %119 : vector<8x16xf32>
    %121 = vector.broadcast %112 : vector<8x1xf32> to vector<8x16xf32>
    %122 = arith.cmpf oge, %110, %121 : vector<8x16xf32>
    %c16_i32_31 = arith.constant 16 : i32
    %123 = vector.broadcast %c16_i32_31 : i32 to vector<8x16xi32>
    %124 = arith.select %122, %7, %123 : vector<8x16xi1>, vector<8x16xi32>
    %cst_32 = arith.constant dense<2147483647> : vector<8xi32>
    %125 = vector.multi_reduction <minsi>, %124, %cst_32 [1] : vector<8x16xi32> to vector<8xi32>
    %126 = vector.shape_cast %125 : vector<8xi32> to vector<8x1xi32>
    %127 = vector.extract_strided_slice %6 {offsets = [0, 112], sizes = [8, 16], strides = [1, 1]} : vector<8x128xf32> to vector<8x16xf32>
    %cst_33 = arith.constant dense<0xFF800000> : vector<8xf32>
    %128 = vector.multi_reduction <maximumf>, %127, %cst_33 [1] : vector<8x16xf32> to vector<8xf32>
    %129 = vector.shape_cast %128 : vector<8xf32> to vector<8x1xf32>
    %130 = vector.broadcast %129 : vector<8x1xf32> to vector<8x16xf32>
    %131 = arith.subf %127, %130 : vector<8x16xf32>
    %132 = math.exp %131 : vector<8x16xf32>
    %cst_34 = arith.constant dense<0.000000e+00> : vector<8xf32>
    %133 = vector.multi_reduction <add>, %132, %cst_34 [1] : vector<8x16xf32> to vector<8xf32>
    %134 = vector.shape_cast %133 : vector<8xf32> to vector<8x1xf32>
    %135 = tpu.reciprocal %134 {approx = true} : vector<8x1xf32> -> vector<8x1xf32>
    %136 = vector.broadcast %135 : vector<8x1xf32> to vector<8x16xf32>
    %137 = arith.mulf %132, %136 : vector<8x16xf32>
    %138 = vector.broadcast %129 : vector<8x1xf32> to vector<8x16xf32>
    %139 = arith.cmpf oge, %127, %138 : vector<8x16xf32>
    %c16_i32_35 = arith.constant 16 : i32
    %140 = vector.broadcast %c16_i32_35 : i32 to vector<8x16xi32>
    %141 = arith.select %139, %7, %140 : vector<8x16xi1>, vector<8x16xi32>
    %cst_36 = arith.constant dense<2147483647> : vector<8xi32>
    %142 = vector.multi_reduction <minsi>, %141, %cst_36 [1] : vector<8x16xi32> to vector<8xi32>
    %143 = vector.shape_cast %142 : vector<8xi32> to vector<8x1xi32>
    %144 = tpu.concatenate %18, %35, %52, %69, %86, %103, %120, %137 in 1 : vector<8x16xf32>, vector<8x16xf32>, vector<8x16xf32>, vector<8x16xf32>, vector<8x16xf32>, vector<8x16xf32>, vector<8x16xf32>, vector<8x16xf32> -> vector<8x128xf32>
    %cst_37 = arith.constant dense<0.000000e+00> : vector<8x256xf32>
    %145 = tpu.matmul %144, %3, %cst_37 {dimension_numbers = #tpu.dot_dimension_numbers<[1], [0], [0], [1], [0, 0, 1, 1], [], []>} : vector<8x128xf32>, vector<128x256xf32>, vector<8x256xf32> -> vector<8x256xf32>
    %c0_38 = arith.constant 0 : index
    %c0_39 = arith.constant 0 : index
    %146 = vector.load %arg4[%c0_38, %c0_39] : memref<8x256xf32, #tpu.memory_space<vmem>>, vector<8x256xf32>
    tpu.vector_store %arg4[%c0_38, %c0_39], %145 {strides = array<i32>} : memref<8x256xf32, #tpu.memory_space<vmem>>, vector<8x256xf32>,
    %147 = tpu.concatenate %24, %41, %58, %75, %92, %109, %126, %143 in 1 : vector<8x1xi32>, vector<8x1xi32>, vector<8x1xi32>, vector<8x1xi32>, vector<8x1xi32>, vector<8x1xi32>, vector<8x1xi32>, vector<8x1xi32> -> vector<8x8xi32>
    %c0_40 = arith.constant 0 : index
    %c0_41 = arith.constant 0 : index
    %c0_42 = arith.constant 0 : index
    %148 = vector.load %arg5[%c0_40, %c0_41, %c0_42] : memref<1x8x8xi32, #tpu.memory_space<vmem>>, vector<1x8x8xi32>
    %149 = vector.shape_cast %148 : vector<1x8x8xi32> to vector<8x8xi32>
    %150 = vector.shape_cast %147 : vector<8x8xi32> to vector<1x8x8xi32>
    tpu.vector_store %arg5[%c0_40, %c0_41, %c0_42], %150 {strides = array<i32>} : memref<1x8x8xi32, #tpu.memory_space<vmem>>, vector<1x8x8xi32>,
    return
  }
  func.func @transform_0(%arg0: i32, %arg1: i32) -> (i32, i32) {
    %c0_i32 = arith.constant 0 : i32
    return %arg1, %arg0 : i32, i32
  }
  func.func @transform_1(%arg0: i32, %arg1: i32) -> (i32, i32, i32) {
    %c0_i32 = arith.constant 0 : i32
    %c0_i32_0 = arith.constant 0 : i32
    %c0_i32_1 = arith.constant 0 : i32
    return %arg0, %c0_i32, %c0_i32_0 : i32, i32, i32
  }
  func.func @transform_2(%arg0: i32, %arg1: i32) -> (i32, i32) {
    %c0_i32 = arith.constant 0 : i32
    return %arg1, %arg0 : i32, i32
  }
  func.func @transform_3(%arg0: i32, %arg1: i32) -> (i32, i32, i32) {
    %c0_i32 = arith.constant 0 : i32
    %c0_i32_0 = arith.constant 0 : i32
    return %arg0, %arg1, %c0_i32 : i32, i32, i32
  }
}

</mosaic_0001>

<bundles_post_ra>
// kernel: tpu_custom_call.1
= control target key start
LH: loop header
LB: loop body
LE: loop exit
PB: predicated region body
PF: predicated region fallthrough
CT: control target
= control target key end

     0   :  { %9 = vsyncpa [#allocation5], 0  ;;  %s2261_s0 = inlined_call_operand.hbm [shape: f32[16,256], index: 0, kind: input, shape index: {}]   ;;  %s2262_s1 = inlined_call_operand.hbm [shape: f32[1,128,256], index: 1, kind: input, shape index: {}]   ;;  %s2263_s2 = inlined_call_operand.hbm [shape: f32[16,256], index: 2, kind: output, shape index: {0}]   ;;  %s2264_s3 = inlined_call_operand.vmem [shape: s32[1,16,8], index: 3, kind: output, shape index: {1}]  }
   0x1   :  { %11 = vsyncpa [#allocation5 + $0x1], 0 }
   0x2   :  { %12 = vsyncpa [#allocation8], 0 }
   0x3   :  { %13 = vsyncpa [#allocation6], 0 }
   0x4   :  { %15 = vsyncpa [#allocation6 + $0x1], 0  ;;  %s1711_s12 = smov 0   ;;  %s1713_s13 = smov 0  }
   0x5   :  { %s1715_s14 = smov 0   ;;  %s1717_s15 = smov 0  }
   0x6   :  { %s1719_s16 = smov 0   ;;  %s1721_s17 = smov 0  }
   0x7 LB: > { %s1265_s18 = sadd.s32 4294967295, %s1676_s17   ;;  %s1266_s19 = sadd.s32 4294967294, %s1676_s17   ;;  %s1676_s17 = sphi %s1721_s17, %s21_s17   ;;  %s1672_s16 = sphi %s1719_s16, %s2288_s16   ;;  %s1668_s15 = sphi %s1717_s15, %s2287_s15   ;;  %s1664_s14 = sphi %s1715_s14, %s2286_s14   ;;  %s1660_s13 = sphi %s1713_s13, %s2285_s13   ;;  %s1656_s12 = sphi %s1711_s12, %s2284_s12  }
   0x8   : > { %p55_p0 = scmp.ne.s32.totalorder %s1660_s13, %s1656_s12  ;;  %p1745_p1 = scmp.eq.s32.totalorder %s1265_s18, 0 }
   0x9   : > { %p1749_p2 = scmp.eq.s32.totalorder %s1265_s18, 1  ;;  %p113_p3 = scmp.eq.s32.totalorder %s1266_s19, 1 }
   0xa   : > { %s2269_s20 = scalar_select %p1745_p1, 1, 0 }
   0xb   : > { %s2270_s21 = scalar_select %p1749_p2, 1, 0 }
   0xc   : > { %p1755_p4 = por %p1745_p1, %p55_p0  ;;  %p1267_p5 = scmp.ge.s32.totalorder %s1676_s17, 1 }
   0xd   : > { %p1760_p6 = por %p113_p3, %p55_p0  ;;  %p148_p7 = scmp.lt.s32.totalorder %s1676_s17, 3 }
   0xe   : > { %s2271_s22 = scalar_select %p1755_p4, 1, 0 }
   0xf   : > { %s2272_s23 = scalar_select %p1760_p6, 1, 0 }
  0x10   : > { %p1765_p8 = pnand %p1267_p5, %p148_p7  ;;  %s1678_s25 = smov [#allocation7]  }
  0x11   : > { %s163_s26 = sshll.u32 %s1678_s25, 4  ;;  %s30_s28 = sadd.s32 1, %s1672_s16  ;;  %s164_s26 = int_to_ptr.vmem [resolvable:$true] %s163_s26 }
  0x12   : > { %s2273_s24 = scalar_select %p1765_p8, 1, 0 }
  0x13   : > { %p1393_p9 = pneg %p1765_p8  ;;  %s1532_s4 = scalar_lea.hbm %s2262_s1, 4096 }
  0x14   : > { %p1533_p12 = scmp.ne.s32.totalorder %s2262_s1, %s1532_s4  ;;  %p1539_p5 = scmp.lt.u32.totalorder %s1532_s4, %s2262_s1 }
  0x15   : > { %p1774_p11 = pnand %p1393_p9, %p1745_p1 }
  0x17   : > { %p1534_p13 = pneg %p1774_p11 }
  0x19   : > { %p1535_p0 = pnand %p1534_p13, %p1533_p12 }
  0x1b   : > { %p1536_p3 = pneg %p1535_p0 }
  0x1d   : > { %p1541_p7 = pnand %p1539_p5, %p1536_p3 }
  0x1f   : > { %1544 = shalt.err (!%p1541_p7)
}
  0x20   : > { %s1545_s9 = scalar_lea.vmem %s164_s26, 4096  ;;  %p1553_p1 = scmp.lt.s32.totalorder %s164_s26, %s164_s26 }
  0x21   : > { %p1546_p9 = scmp.ne.s32.totalorder %s164_s26, %s1545_s9  ;;  %p1554_p4 = scmp.lt.s32.totalorder %s1545_s9, %s1545_s9 }
  0x23   : > { %p1548_p10 = pnand %p1546_p9, %p1534_p13  ;;  %p1555_p8 = por %p1554_p4, %p1553_p1 }
  0x25   : > { %p1549_p6 = pneg %p1548_p10 }
  0x27   : > { %p1556_p2 = pnand %p1555_p8, %p1549_p6 }
  0x29   : > { %1559 = shalt.err (!%p1556_p2)
}
  0x2a   : > { %s1679_s10 = smov 256   ;;  %s1680_s11 = smov 16  }
  0x2b   : > { %1396 = dma.hbm_to_vmem [thread:$0]  (!%p1774_p11), %s2262_s1, 4096, %s164_s26, [#allocation8], %s1679_s10, %s1679_s10, %s1680_s11  }
  0x2c   : > { %p31_p1 = scmp.ge.s32.totalorder %s30_s28, 2  ;;  %s42_s25 = sadd.s32 1, %s1664_s14 }
  0x2d   : > { %p49_p2 = scmp.ne.s32.totalorder %s1664_s14, %s1660_s13  ;;  %p50_p4 = scmp.eq.s32.totalorder %s1676_s17, 0 }
  0x2e   : > { %s2290_s28 = smov (%p31_p1, %s30_s28), 0  ;;  %p2276_p8 = scmp.ne.s32.totalorder %s2270_s21, 0 }
  0x2f   : > { %p1801_p6 = por %p50_p4, %p49_p2  ;;  %s37_s27 = ssub.s32 %s1672_s16, %s2290_s28 }
  0x30   : > { %p1807_p10 = por %p2276_p8, %p49_p2  ;;  %p1406_p12 = scmp.lt.s32.totalorder %s1676_s17, 2 }
  0x31   : > { %p40_p11 = scmp.eq.s32.totalorder %s37_s27, 0  ;;  %s177_s26 = sand.u32 1, %s1664_s14  }
  0x32   : > { %s1270_s4 = sshll.u32 %s177_s26, 4  ;;  %s1284_s6 = sshll.u32 %s1672_s16, 8 }
  0x33   : > { %s1816_s5 = scalar_select %p40_p11, %s1664_s14, %s42_s25  }
  0x34   : > { %s1822_s9 = scalar_lea.hbm %s2261_s0, %s1284_s6  ;;  %s181_s21 = scalar_lea.vmem [#allocation4], %s1270_s4 }
  0x35   : > { %s191_s10 = sshll.u32 %s181_s21, 4  ;;  %p1828_p13 = pnand %p1406_p12, %p1801_p6  ;;  %s1824_s10 = int_to_ptr.vmem [resolvable:$true] %s191_s10 }
  0x36   : > { %s178_s18 = scalar_lea.sflag [#allocation5], %s177_s26  ;;  %s1560_s19 = scalar_lea.hbm %s1822_s9, 256 }
  0x37   : > { %p1561_p0 = scmp.ne.s32.totalorder %s1822_s9, %s1560_s19  ;;  %p1562_p3 = pneg %p1828_p13 }
  0x38   : > { %s1565_s4 = scalar_lea.hbm %s2261_s0, 512  ;;  %p1566_p9 = scmp.lt.u32.totalorder %s1822_s9, %s2261_s0 }
  0x39   : > { %p1563_p5 = pnand %p1562_p3, %p1561_p0  ;;  %p1567_p1 = scmp.lt.u32.totalorder %s1565_s4, %s1560_s19 }
  0x3a   : > { %p1569_p4 = scmp.lt.u32.totalorder %s1560_s19, %s1822_s9 }
  0x3b   : > { %p1564_p7 = pneg %p1563_p5  ;;  %p1568_p2 = por %p1567_p1, %p1566_p9 }
  0x3d   : > { %p1570_p6 = por %p1569_p4, %p1568_p2 }
  0x3f   : > { %p1571_p8 = pnand %p1570_p6, %p1564_p7 }
  0x41   : > { %1574 = shalt.err (!%p1571_p8)
}
  0x42   : > { %s1575_s26 = scalar_lea.vmem %s1824_s10, 256  ;;  %s1681_s7 = smov [#allocation4]  }
  0x43   : > { %p1576_p12 = scmp.ne.s32.totalorder %s1824_s10, %s1575_s26  ;;  %s1580_s8 = sshll.u32 %s1681_s7, 4  ;;  %s1581_s8 = int_to_ptr.vmem [resolvable:$false] %s1580_s8 }
  0x44   : > { %s1582_s21 = scalar_lea.vmem %s1581_s8, 512  ;;  %p1583_p5 = scmp.lt.s32.totalorder %s1824_s10, %s1581_s8 }
  0x45   : > { %p1578_p11 = pnand %p1576_p12, %p1562_p3  ;;  %p1584_p9 = scmp.lt.s32.totalorder %s1582_s21, %s1575_s26 }
  0x47   : > { %p1579_p0 = pneg %p1578_p11  ;;  %p1585_p1 = por %p1584_p9, %p1583_p5 }
  0x49   : > { %p1586_p2 = pnand %p1585_p1, %p1579_p0 }
  0x4b   : > { %1589 = shalt.err (!%p1586_p2)
}
  0x4c   : > { %1400 = dma.hbm_to_vmem [thread:$0]  (!%p1828_p13), %s1822_s9, 256, %s1824_s10, %s178_s18  }
  0x4d   : > { %p2279_p7 = scmp.ne.s32.totalorder %s2273_s24, 0 }
  0x4e   : > { %s1860_s19 = sand.u32 (!%p2279_p7), 1, %s1660_s13   ;;  %p2280_p3 = scmp.ne.s32.totalorder (!%p2279_p7), %s2271_s22, 0 }
  0x4f   : > { %200 = sbr.rel (%p2279_p7) target bundleno = 1790 (0x6fe), region = 28  ;;  %s1274_s25 = sshll.u32 (!%p2279_p7), %s1860_s19, 4 }
  0x50   : > { %s203_s27 = scalar_lea.sflag (!%p2279_p7), [#allocation5], %s1860_s19  ;;  %s1864_s4 = scalar_lea.vmem (!%p2279_p7), [#allocation4], %s1274_s25 }
  0x56   : > { %1643 = dma.done.wait (%p2280_p3), %s203_s27, 256  }
  0x57   : > { %1645 = vsyncadd (%p2280_p3), %s203_s27, 4294967040  ;;  %p2281_p13 = scmp.ne.s32.totalorder %s2269_s20, 0 }
  0x59   : > { %1647 = dma.done.wait (%p2281_p13), [#allocation8], 4096  }
  0x5a   : > { %1649 = vsyncadd (%p2281_p13), [#allocation8], 4294963200  ;;  %p245_p4 = scmp.lt.s32.totalorder %s1668_s15, 1  ;;  %s1881_s29 = scalar_lea.vmem [#allocation9], %s1274_s25 }
  0x5b   : > { %p1278_p6 = scmp.ne.s32.totalorder %s1668_s15, 0 }
  0x5c   : > { %s246_s24 = scalar_select %p245_p4, %s1668_s15, 1 }
  0x5d   : > { %254 = sbr.rel (%p1278_p6) target bundleno = 447 (0x1bf), region = 40  ;;  %v1884_v0 = vld [vmem:[#allocation7] sm:$0xff] (!%p1278_p6)  ;;  %v1886_v1 = vld [vmem:[#allocation7 + $0x8] sm:$0xff] (!%p1278_p6)  ;;  %v1888_v2 = vld [vmem:[#allocation7 + $0x10] sm:$0xff] (!%p1278_p6) }
  0x5e   : > { %s1277_s9 = sshll.u32 %s246_s24, 3  ;;  %v287_v3 = vmul.f32 (!%p1278_p6), %v1884_v0, %v1884_v0  ;;  %v288_v4 = vmul.f32 (!%p1278_p6), %v1886_v1, %v1886_v1  ;;  %v1894_v5 = vld [vmem:[#allocation7 + $0x18] sm:$0xff] (!%p1278_p6)  ;;  %v289_v6 = vmul.f32 (!%p1278_p6), %v1888_v2, %v1888_v2  ;;  %v1898_v7 = vld [vmem:[#allocation7 + $0x20] sm:$0xff] (!%p1278_p6)  ;;  %v1900_v8 = vld [vmem:[#allocation7 + $0x28] sm:$0xff] (!%p1278_p6) }
  0x5f   : > { %s1879_s18 = scalar_lea.vmem %s2264_s3, %s1277_s9  ;;  %v290_v9 = vmul.f32 (!%p1278_p6), %v1894_v5, %v1894_v5  ;;  %v291_v10 = vmul.f32 (!%p1278_p6), %v1898_v7, %v1898_v7  ;;  %v292_v11 = vmul.f32 (!%p1278_p6), %v1900_v8, %v1900_v8  ;;  %v1908_v12 = vld [vmem:[#allocation7 + $0x30] sm:$0xff] (!%p1278_p6)  ;;  %v1910_v13 = vld [vmem:[#allocation7 + $0x38] sm:$0xff] (!%p1278_p6)  ;;  %v1912_v14 = vld [vmem:[#allocation7 + $0x40] sm:$0xff] (!%p1278_p6) }
  0x60   : > { %v319_v15 = vadd.f32 (!%p1278_p6), %v288_v4, %v287_v3  ;;  %v293_v16 = vmul.f32 (!%p1278_p6), %v1908_v12, %v1908_v12  ;;  %v294_v17 = vmul.f32 (!%p1278_p6), %v1910_v13, %v1910_v13  ;;  %v1918_v18 = vld [vmem:[#allocation7 + $0x48] sm:$0xff] (!%p1278_p6)  ;;  %v1920_v19 = vld [vmem:[#allocation7 + $0x50] sm:$0xff] (!%p1278_p6)  ;;  %v1922_v20 = vld [vmem:[#allocation7 + $0x58] sm:$0xff] (!%p1278_p6)  ;;  %v295_v23 = vmul.f32 (!%p1278_p6), %v1912_v14, %v1912_v14 }
  0x61   : > { %v325_v21 = vadd.f32 (!%p1278_p6), %v292_v11, %v291_v10  ;;  %v322_v22 = vadd.f32 (!%p1278_p6), %v290_v9, %v289_v6  ;;  %v296_v24 = vmul.f32 (!%p1278_p6), %v1918_v18, %v1918_v18  ;;  %v297_v26 = vmul.f32 (!%p1278_p6), %v1920_v19, %v1920_v19  ;;  %v1932_v28 = vld [vmem:[#allocation7 + $0x60] sm:$0xff] (!%p1278_p6)  ;;  %v1934_v29 = vld [vmem:[#allocation7 + $0x68] sm:$0xff] (!%p1278_p6)  ;;  %v1936_v30 = vld [vmem:[#allocation7 + $0x70] sm:$0xff] (!%p1278_p6) }
  0x62   : > { %320 = vadd.xlane.f32.xlu0 (!%p1278_p6), %v319_v15  ;;  %v328_v25 = vadd.f32 (!%p1278_p6), %v294_v17, %v293_v16  ;;  %v298_v27 = vmul.f32 (!%p1278_p6), %v1922_v20, %v1922_v20  ;;  %v1938_v31 = vld [vmem:[#allocation7 + $0x78] sm:$0xff] (!%p1278_p6)  ;;  %v299_v33 = vmul.f32 (!%p1278_p6), %v1932_v28, %v1932_v28  ;;  %v300_v34 = vmul.f32 (!%p1278_p6), %v1934_v29, %v1934_v29  ;;  %v1948_v38 = vld [vmem:[#allocation7 + $0x80] sm:$0xff] (!%p1278_p6)  ;;  %v1950_v39 = vld [vmem:[#allocation7 + $0x88] sm:$0xff] (!%p1278_p6) }
  0x63   : > { %326 = vadd.xlane.f32.xlu1 (!%p1278_p6), %v325_v21  ;;  %v331_v32 = vadd.f32 (!%p1278_p6), %v296_v24, %v295_v23  ;;  %v301_v36 = vmul.f32 (!%p1278_p6), %v1936_v30, %v1936_v30  ;;  %v302_v37 = vmul.f32 (!%p1278_p6), %v1938_v31, %v1938_v31  ;;  %v1952_v40 = vld [vmem:[#allocation7 + $0x90] sm:$0xff] (!%p1278_p6)  ;;  %v1954_v41 = vld [vmem:[#allocation7 + $0x98] sm:$0xff] (!%p1278_p6)  ;;  %v303_v43 = vmul.f32 (!%p1278_p6), %v1948_v38, %v1948_v38  ;;  %v1964_v48 = vld [vmem:[#allocation7 + $0xa0] sm:$0xff] (!%p1278_p6) }
  0x64   : > { %v334_v35 = vadd.f32 %v298_v27, %v297_v26  ;;  %v337_v42 = vadd.f32 %v300_v34, %v299_v33  ;;  %v304_v44 = vmul.f32 %v1950_v39, %v1950_v39  ;;  %v305_v46 = vmul.f32 %v1952_v40, %v1952_v40  ;;  %v1966_v49 = vld [vmem:[#allocation7 + $0xa8] sm:$0xff]  ;;  %v1968_v50 = vld [vmem:[#allocation7 + $0xb0] sm:$0xff]  ;;  %v1970_v51 = vld [vmem:[#allocation7 + $0xb8] sm:$0xff] }
  0x65   : > { %v340_v45 = vadd.f32 %v302_v37, %v301_v36  ;;  %v306_v47 = vmul.f32 %v1954_v41, %v1954_v41  ;;  %v307_v53 = vmul.f32 %v1964_v48, %v1964_v48  ;;  %v308_v54 = vmul.f32 %v1966_v49, %v1966_v49  ;;  %v1980_v58 = vld [vmem:[#allocation7 + $0xc0] sm:$0xff]  ;;  %v1982_v59 = vld [vmem:[#allocation7 + $0xc8] sm:$0xff]  ;;  %v1984_v60 = vld [vmem:[#allocation7 + $0xd0] sm:$0xff] }
  0x66   : > { %323 = vadd.xlane.f32.xlu0 %v322_v22  ;;  %v343_v52 = vadd.f32 %v304_v44, %v303_v43  ;;  %v309_v56 = vmul.f32 %v1968_v50, %v1968_v50  ;;  %v310_v57 = vmul.f32 %v1970_v51, %v1970_v51  ;;  %v1986_v61 = vld [vmem:[#allocation7 + $0xd8] sm:$0xff]  ;;  %v311_v63 = vmul.f32 %v1980_v58, %v1980_v58  ;;  %v1996_v10 = vld [vmem:[#allocation7 + $0xe0] sm:$0xff]  ;;  %v1998_v11 = vld [vmem:[#allocation7 + $0xe8] sm:$0xff] }
  0x67   : > { %329 = vadd.xlane.f32.xlu1 %v328_v25  ;;  %v346_v55 = vadd.f32 %v306_v47, %v305_v46  ;;  %v349_v62 = vadd.f32 %v308_v54, %v307_v53  ;;  %v312_v3 = vmul.f32 %v1982_v59, %v1982_v59  ;;  %v313_v6 = vmul.f32 %v1984_v60, %v1984_v60  ;;  %v2000_v15 = vld [vmem:[#allocation7 + $0xf0] sm:$0xff]  ;;  %v2002_v16 = vld [vmem:[#allocation7 + $0xf8] sm:$0xff] }
  0x68   : > { %v352_v4 = vadd.f32 %v310_v57, %v309_v56  ;;  %v314_v9 = vmul.f32 %v1986_v61, %v1986_v61  ;;  %v315_v21 = vmul.f32 %v1996_v10, %v1996_v10  ;;  %v316_v22 = vmul.f32 %v1998_v11, %v1998_v11 }
  0x69   : > { %v355_v17 = vadd.f32 %v312_v3, %v311_v63  ;;  %v317_v24 = vmul.f32 %v2000_v15, %v2000_v15  ;;  %v318_v25 = vmul.f32 %v2002_v16, %v2002_v16 }
  0x6a   : > { %332 = vadd.xlane.f32.xlu0 %v331_v32  ;;  %v358_v23 = vadd.f32 %v314_v9, %v313_v6  ;;  %v361_v26 = vadd.f32 %v316_v22, %v315_v21 }
  0x6b   : > { %335 = vadd.xlane.f32.xlu1 %v334_v35  ;;  %v364_v27 = vadd.f32 %v318_v25, %v317_v24 }
  0x6e   : > { %338 = vadd.xlane.f32.xlu0 %v337_v42 }
  0x6f   : > { %341 = vadd.xlane.f32.xlu1 %v340_v45 }
  0x72   : > { %344 = vadd.xlane.f32.xlu0 %v343_v52 }
  0x73   : > { %347 = vadd.xlane.f32.xlu1 %v346_v55 }
  0x76   : > { %350 = vadd.xlane.f32.xlu0 %v349_v62 }
  0x77   : > { %353 = vadd.xlane.f32.xlu1 %v352_v4 }
  0x7a   : > { %356 = vadd.xlane.f32.xlu0 %v355_v17 }
  0x7b   : > { %359 = vadd.xlane.f32.xlu1 %v358_v23 }
  0x7e   : > { %362 = vadd.xlane.f32.xlu0 %v361_v26 }
  0x7f   : > { %365 = vadd.xlane.f32.xlu1 %v364_v27 }
  0xef   : > { %v321_v32 = vpop.xlane.xlu0 %320 }
  0xf0   : > { %v367_v33 = vmax.f32 %v321_v32, 1e-24  ;;  %v327_v34 = vpop.xlane.xlu1 %326 }
  0xf1   : > { %v369_v35 = vmax.f32 %v327_v34, 1e-24 }
  0xf2   : > { %1468 = vrsqrt.f32 %v367_v33 }
  0xf3   : > { %v324_v36 = vpop.xlane.xlu0 %323  ;;  %1470 = vrsqrt.f32 %v369_v35 }
  0xf4   : > { %v368_v37 = vmax.f32 %v324_v36, 1e-24  ;;  %v330_v42 = vpop.xlane.xlu1 %329 }
  0xf5   : > { %v370_v43 = vmax.f32 %v330_v42, 1e-24 }
  0xf6   : > { %1472 = vrsqrt.f32 %v368_v37 }
  0xf7   : > { %1474 = vrsqrt.f32 %v370_v43  ;;  %v333_v44 = vpop.xlane.xlu0 %332 }
  0xf8   : > { %v371_v45 = vmax.f32 %v333_v44, 1e-24  ;;  %v336_v46 = vpop.xlane.xlu1 %335 }
  0xf9   : > { %v372_v47 = vmax.f32 %v336_v46, 1e-24 }
  0xfa   : > { %1476 = vrsqrt.f32 %v371_v45 }
  0xfb   : > { %1478 = vrsqrt.f32 %v372_v47  ;;  %v339_v52 = vpop.xlane.xlu0 %338 }
  0xfc   : > { %v1469_v53 = vpop.eup %1468  ;;  %v373_v54 = vmax.f32 %v339_v52, 1e-24  ;;  %v342_v55 = vpop.xlane.xlu1 %341 }
  0xfd   : > { %v1471_v56 = vpop.eup %1470  ;;  %v400_v57 = vmul.f32 %v1469_v53, %v1886_v1  ;;  %v399_v62 = vmul.f32 %v1469_v53, %v1884_v0  ;;  %v374_v63 = vmax.f32 %v342_v55, 1e-24 }
  0xfe   : > { %1480 = vrsqrt.f32 %v373_v54  ;;  %v404_v3 = vmul.f32 %v1471_v56, %v1900_v8  ;;  %v403_v4 = vmul.f32 %v1471_v56, %v1898_v7 }
  0xff   : > { %v464_v6 = vmul.f32 20.0, %v400_v57  ;;  %432 = vst [vmem:[#allocation2 + $0x8] sm:$0xff] %v400_v57  ;;  %v463_v9 = vmul.f32 20.0, %v399_v62  ;;  %431 = vst [vmem:[#allocation2] sm:$0xff] %v399_v62  ;;  %1482 = vrsqrt.f32 %v374_v63  ;;  %v345_v17 = vpop.xlane.xlu0 %344 }
 0x100   : > { %v1473_v21 = vpop.eup %1472  ;;  %436 = vst [vmem:[#allocation2 + $0x28] sm:$0xff] %v404_v3  ;;  %435 = vst [vmem:[#allocation2 + $0x20] sm:$0xff] %v403_v4  ;;  %v375_v22 = vmax.f32 %v345_v17, 1e-24  ;;  %v348_v23 = vpop.xlane.xlu1 %347  ;;  %v468_v34 = vmul.f32 20.0, %v404_v3 }
 0x101   : > { %v1475_v1 = vpop.eup %1474  ;;  %527 = vxpose.xlu1.b32.start [1/16] %v464_v6, 128  ;;  %495 = vxpose.xlu0.b32.start [1/16] %v463_v9, 128  ;;  %v402_v0 = vmul.f32 %v1473_v21, %v1894_v5  ;;  %v401_v8 = vmul.f32 %v1473_v21, %v1888_v2  ;;  %v376_v24 = vmax.f32 %v348_v23, 1e-24  ;;  %v467_v2 = vmul.f32 20.0, %v403_v4 }
 0x102   : > { %v406_v7 = vmul.f32 %v1475_v1, %v1910_v13  ;;  %v405_v25 = vmul.f32 %v1475_v1, %v1908_v12  ;;  %1484 = vrsqrt.f32 %v375_v22 }
 0x103   : > { %v466_v26 = vmul.f32 20.0, %v402_v0  ;;  %434 = vst [vmem:[#allocation2 + $0x18] sm:$0xff] %v402_v0  ;;  %v465_v27 = vmul.f32 20.0, %v401_v8  ;;  %433 = vst [vmem:[#allocation2 + $0x10] sm:$0xff] %v401_v8  ;;  %1486 = vrsqrt.f32 %v376_v24  ;;  %v351_v32 = vpop.xlane.xlu0 %350 }
 0x104   : > { %v1477_v33 = vpop.eup %1476  ;;  %438 = vst [vmem:[#allocation2 + $0x38] sm:$0xff] %v406_v7  ;;  %437 = vst [vmem:[#allocation2 + $0x30] sm:$0xff] %v405_v25  ;;  %v377_v35 = vmax.f32 %v351_v32, 1e-24  ;;  %v354_v5 = vpop.xlane.xlu1 %353  ;;  %v470_v46 = vmul.f32 20.0, %v406_v7 }
 0x105   : > { %v1479_v36 = vpop.eup %1478  ;;  %528 = vxpose.xlu1.b32.cont [2/16] %v466_v26, 128  ;;  %496 = vxpose.xlu0.b32.cont [2/16] %v465_v27, 128  ;;  %v408_v13 = vmul.f32 %v1477_v33, %v1918_v18  ;;  %v407_v12 = vmul.f32 %v1477_v33, %v1912_v14  ;;  %v378_v37 = vmax.f32 %v354_v5, 1e-24  ;;  %v469_v14 = vmul.f32 20.0, %v405_v25 }
 0x106   : > { %v410_v42 = vmul.f32 %v1479_v36, %v1922_v20  ;;  %v409_v43 = vmul.f32 %v1479_v36, %v1920_v19  ;;  %1488 = vrsqrt.f32 %v377_v35 }
 0x107   : > { %440 = vst [vmem:[#allocation2 + $0x48] sm:$0xff] %v408_v13  ;;  %439 = vst [vmem:[#allocation2 + $0x40] sm:$0xff] %v407_v12  ;;  %1490 = vrsqrt.f32 %v378_v37  ;;  %v357_v44 = vpop.xlane.xlu0 %356  ;;  %v472_v62 = vmul.f32 20.0, %v408_v13 }
 0x108   : > { %v1481_v45 = vpop.eup %1480  ;;  %442 = vst [vmem:[#allocation2 + $0x58] sm:$0xff] %v410_v42  ;;  %441 = vst [vmem:[#allocation2 + $0x50] sm:$0xff] %v409_v43  ;;  %v379_v47 = vmax.f32 %v357_v44, 1e-24  ;;  %v360_v52 = vpop.xlane.xlu1 %359  ;;  %v474_v22 = vmul.f32 20.0, %v410_v42  ;;  %v473_v23 = vmul.f32 20.0, %v409_v43 }
 0x109   : > { %v1483_v53 = vpop.eup %1482  ;;  %529 = vxpose.xlu1.b32.cont [3/16] %v468_v34, 128  ;;  %497 = vxpose.xlu0.b32.cont [3/16] %v467_v2, 128  ;;  %v412_v18 = vmul.f32 %v1481_v45, %v1934_v29  ;;  %v411_v20 = vmul.f32 %v1481_v45, %v1932_v28  ;;  %v380_v19 = vmax.f32 %v360_v52, 1e-24  ;;  %v471_v28 = vmul.f32 20.0, %v407_v12 }
 0x10a   : > { %v414_v54 = vmul.f32 %v1483_v53, %v1938_v31  ;;  %v413_v55 = vmul.f32 %v1483_v53, %v1936_v30  ;;  %1492 = vrsqrt.f32 %v379_v47 }
 0x10b   : > { %444 = vst [vmem:[#allocation2 + $0x68] sm:$0xff] %v412_v18  ;;  %443 = vst [vmem:[#allocation2 + $0x60] sm:$0xff] %v411_v20  ;;  %1494 = vrsqrt.f32 %v380_v19  ;;  %v363_v56 = vpop.xlane.xlu0 %362  ;;  %v476_v8 = vmul.f32 20.0, %v412_v18  ;;  %v475_v24 = vmul.f32 20.0, %v411_v20 }
 0x10c   : > { %v1485_v57 = vpop.eup %1484  ;;  %446 = vst [vmem:[#allocation2 + $0x78] sm:$0xff] %v414_v54  ;;  %445 = vst [vmem:[#allocation2 + $0x70] sm:$0xff] %v413_v55  ;;  %v381_v63 = vmax.f32 %v363_v56, 1e-24  ;;  %v366_v3 = vpop.xlane.xlu1 %365  ;;  %v478_v26 = vmul.f32 20.0, %v414_v54  ;;  %v477_v27 = vmul.f32 20.0, %v413_v55 }
 0x10d   : > { %v1487_v4 = vpop.eup %1486  ;;  %530 = vxpose.xlu1.b32.cont [4/16] %v470_v46, 128  ;;  %498 = vxpose.xlu0.b32.cont [4/16] %v469_v14, 128  ;;  %v416_v29 = vmul.f32 %v1485_v57, %v1950_v39  ;;  %v415_v31 = vmul.f32 %v1485_v57, %v1948_v38  ;;  %v382_v30 = vmax.f32 %v366_v3, 1e-24 }
 0x10e   : > { %v418_v6 = vmul.f32 %v1487_v4, %v1954_v41  ;;  %v417_v9 = vmul.f32 %v1487_v4, %v1952_v40  ;;  %1496 = vrsqrt.f32 %v381_v63 }
 0x10f   : > { %448 = vst [vmem:[#allocation2 + $0x88] sm:$0xff] %v416_v29  ;;  %447 = vst [vmem:[#allocation2 + $0x80] sm:$0xff] %v415_v31  ;;  %1498 = vrsqrt.f32 %v382_v30  ;;  %v479_v33 = vmul.f32 20.0, %v415_v31 }
 0x110   : > { %v1489_v17 = vpop.eup %1488  ;;  %450 = vst [vmem:[#allocation2 + $0x98] sm:$0xff] %v418_v6  ;;  %449 = vst [vmem:[#allocation2 + $0x90] sm:$0xff] %v417_v9  ;;  %v482_v34 = vmul.f32 20.0, %v418_v6  ;;  %v481_v35 = vmul.f32 20.0, %v417_v9 }
 0x111   : > { %v1491_v21 = vpop.eup %1490  ;;  %531 = vxpose.xlu1.b32.cont [5/16] %v472_v62, 128  ;;  %499 = vxpose.xlu0.b32.cont [5/16] %v471_v28, 128  ;;  %v420_v39 = vmul.f32 %v1489_v17, %v1966_v49  ;;  %v419_v38 = vmul.f32 %v1489_v17, %v1964_v48 }
 0x112   : > { %v422_v41 = vmul.f32 %v1491_v21, %v1970_v51  ;;  %v421_v40 = vmul.f32 %v1491_v21, %v1968_v50 }
 0x113   : > { %452 = vst [vmem:[#allocation2 + $0xa8] sm:$0xff] %v420_v39  ;;  %451 = vst [vmem:[#allocation2 + $0xa0] sm:$0xff] %v419_v38 }
 0x114   : > { %v1493_v1 = vpop.eup %1492  ;;  %454 = vst [vmem:[#allocation2 + $0xb8] sm:$0xff] %v422_v41  ;;  %453 = vst [vmem:[#allocation2 + $0xb0] sm:$0xff] %v421_v40 }
 0x115   : > { %v1495_v0 = vpop.eup %1494  ;;  %532 = vxpose.xlu1.b32.cont [6/16] %v474_v22, 128  ;;  %500 = vxpose.xlu0.b32.cont [6/16] %v473_v23, 128  ;;  %v424_v7 = vmul.f32 %v1493_v1, %v1982_v59  ;;  %v423_v49 = vmul.f32 %v1493_v1, %v1980_v58 }
 0x116   : > { %v426_v48 = vmul.f32 %v1495_v0, %v1986_v61  ;;  %v425_v51 = vmul.f32 %v1495_v0, %v1984_v60  ;;  %v480_v60 = vmul.f32 20.0, %v416_v29 }
 0x117   : > { %456 = vst [vmem:[#allocation2 + $0xc8] sm:$0xff] %v424_v7  ;;  %455 = vst [vmem:[#allocation2 + $0xc0] sm:$0xff] %v423_v49  ;;  %v488_v5 = vmul.f32 20.0, %v424_v7  ;;  %v487_v36 = vmul.f32 20.0, %v423_v49 }
 0x118   : > { %v1497_v50 = vpop.eup %1496  ;;  %458 = vst [vmem:[#allocation2 + $0xd8] sm:$0xff] %v426_v48  ;;  %457 = vst [vmem:[#allocation2 + $0xd0] sm:$0xff] %v425_v51  ;;  %v490_v2 = vmul.f32 20.0, %v426_v48  ;;  %v489_v13 = vmul.f32 20.0, %v425_v51 }
 0x119   : > { %v1499_v25 = vpop.eup %1498  ;;  %533 = vxpose.xlu1.b32.cont [7/16] %v476_v8, 128  ;;  %501 = vxpose.xlu0.b32.cont [7/16] %v475_v24, 128  ;;  %v428_v32 = vmul.f32 %v1497_v50, %v1998_v11  ;;  %v427_v59 = vmul.f32 %v1497_v50, %v1996_v10  ;;  %v484_v11 = vmul.f32 20.0, %v420_v39  ;;  %v483_v10 = vmul.f32 20.0, %v419_v38 }
 0x11a   : > { %v430_v58 = vmul.f32 %v1499_v25, %v2002_v16  ;;  %v429_v61 = vmul.f32 %v1499_v25, %v2000_v15  ;;  %v486_v16 = vmul.f32 20.0, %v422_v41  ;;  %v485_v15 = vmul.f32 20.0, %v421_v40 }
 0x11b   : > { %460 = vst [vmem:[#allocation2 + $0xe8] sm:$0xff] %v428_v32  ;;  %459 = vst [vmem:[#allocation2 + $0xe0] sm:$0xff] %v427_v59  ;;  %v492_v12 = vmul.f32 20.0, %v428_v32  ;;  %v491_v37 = vmul.f32 20.0, %v427_v59 }
 0x11c   : > { %462 = vst [vmem:[#allocation2 + $0xf8] sm:$0xff] %v430_v58  ;;  %461 = vst [vmem:[#allocation2 + $0xf0] sm:$0xff] %v429_v61  ;;  %v494_v42 = vmul.f32 20.0, %v430_v58  ;;  %v493_v43 = vmul.f32 20.0, %v429_v61 }
 0x11d   : > { %534 = vxpose.xlu1.b32.cont [8/16] %v478_v26, 128  ;;  %502 = vxpose.xlu0.b32.cont [8/16] %v477_v27, 128 }
 0x121   : > { %535 = vxpose.xlu1.b32.cont [9/16] %v480_v60, 128  ;;  %503 = vxpose.xlu0.b32.cont [9/16] %v479_v33, 128 }
 0x125   : > { %536 = vxpose.xlu1.b32.cont [10/16] %v482_v34, 128  ;;  %504 = vxpose.xlu0.b32.cont [10/16] %v481_v35, 128 }
 0x129   : > { %537 = vxpose.xlu1.b32.cont [11/16] %v484_v11, 128  ;;  %505 = vxpose.xlu0.b32.cont [11/16] %v483_v10, 128 }
 0x12d   : > { %538 = vxpose.xlu1.b32.cont [12/16] %v486_v16, 128  ;;  %506 = vxpose.xlu0.b32.cont [12/16] %v485_v15, 128 }
 0x131   : > { %539 = vxpose.xlu1.b32.cont [13/16] %v488_v5, 128  ;;  %507 = vxpose.xlu0.b32.cont [13/16] %v487_v36, 128 }
 0x135   : > { %540 = vxpose.xlu1.b32.cont [14/16] %v490_v2, 128  ;;  %508 = vxpose.xlu0.b32.cont [14/16] %v489_v13, 128 }
 0x139   : > { %541 = vxpose.xlu1.b32.cont [15/16] %v492_v12, 128  ;;  %509 = vxpose.xlu0.b32.cont [15/16] %v491_v37, 128 }
 0x13d   : > { %542 = vxpose.xlu1.b32.end [16/16] %v494_v42, 128  ;;  %510 = vxpose.xlu0.b32.end [16/16] %v493_v43, 128 }
 0x181   : > { %v543_v44 = vpop.trf.xlu1  ;;  %v511_v45 = vpop.trf.xlu0 }
 0x182   : > { %575 = vst [vmem:[#allocation3 + $0x80] sm:$0xff] %v543_v44  ;;  %559 = vst [vmem:[#allocation3] sm:$0xff] %v511_v45 }
 0x185   : > { %v544_v46 = vpop.trf.xlu1  ;;  %v512_v47 = vpop.trf.xlu0 }
 0x186   : > { %576 = vst [vmem:[#allocation3 + $0x88] sm:$0xff] %v544_v46  ;;  %560 = vst [vmem:[#allocation3 + $0x8] sm:$0xff] %v512_v47 }
 0x189   : > { %v545_v52 = vpop.trf.xlu1  ;;  %v513_v53 = vpop.trf.xlu0 }
 0x18a   : > { %577 = vst [vmem:[#allocation3 + $0x90] sm:$0xff] %v545_v52  ;;  %561 = vst [vmem:[#allocation3 + $0x10] sm:$0xff] %v513_v53 }
 0x18d   : > { %v546_v14 = vpop.trf.xlu1  ;;  %v514_v18 = vpop.trf.xlu0 }
 0x18e   : > { %578 = vst [vmem:[#allocation3 + $0x98] sm:$0xff] %v546_v14  ;;  %562 = vst [vmem:[#allocation3 + $0x18] sm:$0xff] %v514_v18 }
 0x191   : > { %v547_v20 = vpop.trf.xlu1  ;;  %v515_v19 = vpop.trf.xlu0 }
 0x192   : > { %579 = vst [vmem:[#allocation3 + $0xa0] sm:$0xff] %v547_v20  ;;  %563 = vst [vmem:[#allocation3 + $0x20] sm:$0xff] %v515_v19 }
 0x195   : > { %v548_v54 = vpop.trf.xlu1  ;;  %v516_v55 = vpop.trf.xlu0 }
 0x196   : > { %580 = vst [vmem:[#allocation3 + $0xa8] sm:$0xff] %v548_v54  ;;  %564 = vst [vmem:[#allocation3 + $0x28] sm:$0xff] %v516_v55 }
 0x199   : > { %v549_v56 = vpop.trf.xlu1  ;;  %v517_v57 = vpop.trf.xlu0 }
 0x19a   : > { %581 = vst [vmem:[#allocation3 + $0xb0] sm:$0xff] %v549_v56  ;;  %565 = vst [vmem:[#allocation3 + $0x30] sm:$0xff] %v517_v57 }
 0x19d   : > { %v550_v62 = vpop.trf.xlu1  ;;  %v518_v63 = vpop.trf.xlu0 }
 0x19e   : > { %582 = vst [vmem:[#allocation3 + $0xb8] sm:$0xff] %v550_v62  ;;  %566 = vst [vmem:[#allocation3 + $0x38] sm:$0xff] %v518_v63 }
 0x1a1   : > { %v551_v3 = vpop.trf.xlu1  ;;  %v519_v4 = vpop.trf.xlu0 }
 0x1a2   : > { %583 = vst [vmem:[#allocation3 + $0xc0] sm:$0xff] %v551_v3  ;;  %567 = vst [vmem:[#allocation3 + $0x40] sm:$0xff] %v519_v4 }
 0x1a5   : > { %v552_v28 = vpop.trf.xlu1  ;;  %v520_v29 = vpop.trf.xlu0 }
 0x1a6   : > { %584 = vst [vmem:[#allocation3 + $0xc8] sm:$0xff] %v552_v28  ;;  %568 = vst [vmem:[#allocation3 + $0x48] sm:$0xff] %v520_v29 }
 0x1a9   : > { %v553_v31 = vpop.trf.xlu1  ;;  %v521_v30 = vpop.trf.xlu0 }
 0x1aa   : > { %585 = vst [vmem:[#allocation3 + $0xd0] sm:$0xff] %v553_v31  ;;  %569 = vst [vmem:[#allocation3 + $0x50] sm:$0xff] %v521_v30 }
 0x1ad   : > { %v554_v6 = vpop.trf.xlu1  ;;  %v522_v9 = vpop.trf.xlu0 }
 0x1ae   : > { %586 = vst [vmem:[#allocation3 + $0xd8] sm:$0xff] %v554_v6  ;;  %570 = vst [vmem:[#allocation3 + $0x58] sm:$0xff] %v522_v9 }
 0x1b1   : > { %v555_v17 = vpop.trf.xlu1  ;;  %v523_v21 = vpop.trf.xlu0 }
 0x1b2   : > { %587 = vst [vmem:[#allocation3 + $0xe0] sm:$0xff] %v555_v17  ;;  %571 = vst [vmem:[#allocation3 + $0x60] sm:$0xff] %v523_v21 }
 0x1b5   : > { %v556_v22 = vpop.trf.xlu1  ;;  %v524_v23 = vpop.trf.xlu0 }
 0x1b6   : > { %588 = vst [vmem:[#allocation3 + $0xe8] sm:$0xff] %v556_v22  ;;  %572 = vst [vmem:[#allocation3 + $0x68] sm:$0xff] %v524_v23 }
 0x1b9   : > { %v557_v39 = vpop.trf.xlu1  ;;  %v525_v38 = vpop.trf.xlu0 }
 0x1ba   : > { %589 = vst [vmem:[#allocation3 + $0xf0] sm:$0xff] %v557_v39  ;;  %573 = vst [vmem:[#allocation3 + $0x70] sm:$0xff] %v525_v38 }
 0x1bd   : > { %v558_v41 = vpop.trf.xlu1  ;;  %v526_v40 = vpop.trf.xlu0 }
 0x1be   : > { %590 = vst [vmem:[#allocation3 + $0xf8] sm:$0xff] %v558_v41  ;;  %574 = vst [vmem:[#allocation3 + $0x78] sm:$0xff] %v526_v40 }
 0x1bf PF: > { %v639_v1 = vld [vmem:[#allocation3 + $0x80] sm:$0xff]  ;;  %v640_v0 = vld [vmem:[#allocation3 + $0x88] sm:$0xff]  ;;  %v641_v49 = vld [vmem:[#allocation3 + $0x90] sm:$0xff]  ;;  %vm828_vm0 = vcmask 523648   ;;  %vm758_vm1 = vcmask 261248   ;;  %vm863_vm2 = vcmask 654848   ;;  %v727_v38 = vlaneseq }
 0x1c0   : > { %v623_v8 = vld [vmem:[#allocation3] sm:$0xff]  ;;  %v1321_v24 = vpack.c.bf16 %v640_v0, %v639_v1  ;;  %v624_v7 = vld [vmem:[#allocation3 + $0x8] sm:$0xff]  ;;  %v642_v48 = vld [vmem:[#allocation3 + $0x98] sm:$0xff]  ;;  %vm793_vm3 = vcmask 392448   ;;  %vm933_vm4 = vcmask 917248   ;;  %vm898_vm5 = vcmask 786048  }
 0x1c1   : > { %v1323_v51 = vpack.c.bf16 %v624_v7, %v623_v8  ;;  %v1325_v50 = vpack.c.bf16 %v642_v48, %v641_v49  ;;  %v625_v25 = vld [vmem:[#allocation3 + $0x10] sm:$0xff]  ;;  %v626_v26 = vld [vmem:[#allocation3 + $0x18] sm:$0xff]  ;;  %v643_v27 = vld [vmem:[#allocation3 + $0xa0] sm:$0xff]  ;;  %vm968_vm6 = vcmask 1048448   ;;  %vm729_vm7 = vcmask 130048   ;;  %s1682_s20 = smov 16  }
 0x1c2   : > { %1322 = vmatprep.subr.bf16.mxu0 %v1321_v24  ;;  %v644_v32 = vld [vmem:[#allocation3 + $0xa8] sm:$0xff]  ;;  %v1327_v59 = vpack.c.bf16 %v626_v26, %v625_v25  ;;  %v627_v61 = vld [vmem:[#allocation3 + $0x20] sm:$0xff]  ;;  %v645_v33 = vld [vmem:[#allocation3 + $0xb0] sm:$0xff]  ;;  %v2064_v41 = vand.u32 127, %v727_v38  ;;  %s1683_s22 = smov 32   ;;  %s1684_s6 = smov 112  }
 0x1c3   : > { %1324 = vmatpush3.bf16.msra.mxu0 %v1323_v51  ;;  %v1329_v58 = vpack.c.bf16 %v644_v32, %v643_v27  ;;  %v628_v60 = vld [vmem:[#allocation3 + $0x28] sm:$0xff]  ;;  %v646_v34 = vld [vmem:[#allocation3 + $0xb8] sm:$0xff]  ;;  %v629_v10 = vld [vmem:[#allocation3 + $0x30] sm:$0xff]  ;;  %s1685_s26 = smov 96   ;;  %s1686_s7 = smov 80   ;;  %vm1004_vm13 = vcmask 261120  }
 0x1c4   : > { %1326 = vmatprep.subr.bf16.mxu0 %v1325_v50  ;;  %v1331_v35 = vpack.c.bf16 %v628_v60, %v627_v61  ;;  %v1333_v11 = vpack.c.bf16 %v646_v34, %v645_v33  ;;  %v630_v16 = vld [vmem:[#allocation3 + $0x38] sm:$0xff]  ;;  %v647_v15 = vld [vmem:[#allocation3 + $0xc0] sm:$0xff]  ;;  %v648_v5 = vld [vmem:[#allocation3 + $0xc8] sm:$0xff]  ;;  %s1687_s8 = smov 64   ;;  %s1688_s21 = smov 48  }
 0x1c5   : > { %v656_v36 = vld [vmem:[%s1864_s4 + $0x8] sm:$0xff]  ;;  %v1335_v2 = vpack.c.bf16 %v630_v16, %v629_v10  ;;  %v1337_v13 = vpack.c.bf16 %v648_v5, %v647_v15  ;;  %v631_v12 = vld [vmem:[#allocation3 + $0x40] sm:$0xff]  ;;  %v649_v42 = vld [vmem:[#allocation3 + $0xd0] sm:$0xff]  ;;  %s1285_s25 = sshll.u32 %s1668_s15, 8  ;;  %s1130_s27 = sshll.u32 %s1881_s29, 4  ;;  %s1131_s27 = int_to_ptr.vmem [resolvable:$true] %s1130_s27 }
 0x1c6   : > { %721 = vmatprep.mubr.f32.mxu0 %v656_v36  ;;  %v632_v37 = vld [vmem:[#allocation3 + $0x48] sm:$0xff]  ;;  %v650_v43 = vld [vmem:[#allocation3 + $0xd8] sm:$0xff]  ;;  %v633_v46 = vld [vmem:[#allocation3 + $0x50] sm:$0xff]  ;;  %s2215_s9 = scalar_lea.hbm %s2263_s2, %s1285_s25  ;;  %s1106_s10 = scalar_lea.sflag [#allocation6], %s1860_s19 }
 0x1c7   : > { %1328 = vmatpush3.bf16.msra.mxu0 %v1327_v59  ;;  %v1339_v44 = vpack.c.bf16 %v632_v37, %v631_v12  ;;  %v1341_v45 = vpack.c.bf16 %v650_v43, %v649_v42  ;;  %v634_v47 = vld [vmem:[#allocation3 + $0x58] sm:$0xff]  ;;  %v651_v52 = vld [vmem:[#allocation3 + $0xe0] sm:$0xff]  ;;  %v652_v53 = vld [vmem:[#allocation3 + $0xe8] sm:$0xff]  ;;  %s1590_s11 = scalar_lea.vmem %s1131_s27, 256 }
 0x1c8   : > { %1330 = vmatprep.subr.bf16.mxu0 %v1329_v58  ;;  %v1343_v14 = vpack.c.bf16 %v634_v47, %v633_v46  ;;  %v1345_v18 = vpack.c.bf16 %v652_v53, %v651_v52  ;;  %v635_v20 = vld [vmem:[#allocation3 + $0x60] sm:$0xff]  ;;  %v636_v19 = vld [vmem:[#allocation3 + $0x68] sm:$0xff]  ;;  %v653_v54 = vld [vmem:[#allocation3 + $0xf0] sm:$0xff]  ;;  %p1591_p8 = scmp.ne.s32.totalorder %s1131_s27, %s1590_s11 }
 0x1c9   : > { %v654_v55 = vld [vmem:[#allocation3 + $0xf8] sm:$0xff]  ;;  %v1347_v56 = vpack.c.bf16 %v636_v19, %v635_v20  ;;  %v637_v62 = vld [vmem:[#allocation3 + $0x70] sm:$0xff] }
 0x1ca   : > { %v1349_v57 = vpack.c.bf16 %v654_v55, %v653_v54  ;;  %v638_v63 = vld [vmem:[#allocation3 + $0x78] sm:$0xff]  ;;  %v655_v4 = vld [vmem:[%s1864_s4] sm:$0xff]  ;;  %p1592_p12 = pnand %p1591_p8, %p1807_p10 }
 0x1cb   : > { %1332 = vmatpush3.bf16.msra.mxu0 %v1331_v35  ;;  %v1351_v3 = vpack.c.bf16 %v638_v63, %v637_v62 }
 0x1cc   : > { %1334 = vmatprep.subr.bf16.mxu0 %v1333_v11  ;;  %p1593_p11 = pneg %p1592_p12 }
 0x1cf   : > { %1336 = vmatpush3.bf16.msra.mxu0 %v1335_v2 }
 0x1d0   : > { %1338 = vmatprep.subr.bf16.mxu0 %v1337_v13 }
 0x1d3   : > { %1340 = vmatpush3.bf16.msra.mxu0 %v1339_v44 }
 0x1d4   : > { %1342 = vmatprep.subr.bf16.mxu0 %v1341_v45 }
 0x1d7   : > { %1344 = vmatpush3.bf16.msra.mxu0 %v1343_v14 }
 0x1d8   : > { %1346 = vmatprep.subr.bf16.mxu0 %v1345_v18 }
 0x1db   : > { %1348 = vmatpush3.bf16.msra.mxu0 %v1347_v56 }
 0x1dc   : > { %1350 = vmatprep.subr.bf16.mxu0 %v1349_v57 }
 0x1df   : > { %1352 = vmatpush3.bf16.msra.mxu0 %v1351_v3 }
 0x1e2   : > { %722 = vmatmul.mubr.f32.vlgmr.msra.gmra.mrb[0].mxu0 %v655_v4 }
 0x2b5   : > { %v1318_v28 = vpop.f32.mrb[0].mxu0 }
 0x2b6   : > { %v1319_v29 = vpop.f32.mrb[1].mxu0 }
 0x2b7   : > { %v2046_v31 = vadd.f32 %v1319_v29, %v1318_v28 }
 0x2b9   : > { %v829_v30 = vsel %vm828_vm0, %v2046_v31, -inf  ;;  %v759_v6 = vsel %vm758_vm1, %v2046_v31, -inf  ;;  %v864_v9 = vsel %vm863_vm2, %v2046_v31, -inf  ;;  %v794_v17 = vsel %vm793_vm3, %v2046_v31, -inf }
 0x2ba   : > { %830 = vmax.xlane.f32.xlu1 %v829_v30  ;;  %760 = vmax.xlane.f32.xlu0 %v759_v6  ;;  %v934_v21 = vsel %vm933_vm4, %v2046_v31, -inf  ;;  %v899_v22 = vsel %vm898_vm5, %v2046_v31, -inf  ;;  %v969_v23 = vsel %vm968_vm6, %v2046_v31, -inf  ;;  %v730_v39 = vsel %vm729_vm7, %v2046_v31, -inf }
 0x2be   : > { %865 = vmax.xlane.f32.xlu1 %v864_v9  ;;  %795 = vmax.xlane.f32.xlu0 %v794_v17 }
 0x2c2   : > { %935 = vmax.xlane.f32.xlu1 %v934_v21  ;;  %900 = vmax.xlane.f32.xlu0 %v899_v22 }
 0x2c6   : > { %970 = vmax.xlane.f32.xlu0 %v969_v23  ;;  %731 = vmax.xlane.f32.xlu1 %v730_v39 }
 0x2dc   : > { %775 = vrot.lane.b32.xlu0 %v2064_v41, %s1682_s20 }
 0x347   : > { %v2068_v40 = vpop.xlane.xlu1 %830  ;;  %v761_v49 = vpop.xlane.xlu0 %760 }
 0x348   : > { %v762_v25 = vsub.f32 %v2046_v31, %v761_v49  ;;  %v832_v61 = vsub.f32 %v2046_v31, %v2068_v40  ;;  %vm774_vm9 = vcmp.ge.f32.partialorder %v2046_v31, %v761_v49 }
 0x34a   : > { %v763_v32 = vmul.f32 1.442695, %v762_v25  ;;  %v833_v34 = vmul.f32 1.442695, %v832_v61 }
 0x34b   : > { %v2070_v1 = vpop.xlane.xlu1 %865  ;;  %v2080_v27 = vpop.xlane.xlu0 %795 }
 0x34c   : > { %v797_v59 = vsub.f32 %v2046_v31, %v2080_v27  ;;  %v867_v35 = vsub.f32 %v2046_v31, %v2070_v1  ;;  %vm809_vm12 = vcmp.ge.f32.partialorder %v2046_v31, %v2080_v27  ;;  %vm879_vm14 = vcmp.ge.f32.partialorder %v2046_v31, %v2070_v1 }
 0x34e   : > { %v798_v60 = vmul.f32 1.442695, %v797_v59  ;;  %v868_v11 = vmul.f32 1.442695, %v867_v35 }
 0x34f   : > { %v2072_v0 = vpop.xlane.xlu1 %935  ;;  %v2090_v33 = vpop.xlane.xlu0 %900 }
 0x350   : > { %v937_v8 = vsub.f32 %v2046_v31, %v2072_v0  ;;  %v902_v10 = vsub.f32 %v2046_v31, %v2090_v33 }
 0x352   : > { %v938_v24 = vmul.f32 1.442695, %v937_v8  ;;  %v903_v36 = vmul.f32 1.442695, %v902_v10  ;;  %v592_v10 = vld [vmem:[#allocation2 + $0x8] sm:$0xff] }
 0x353   : > { %v732_v7 = vpop.xlane.xlu1 %731  ;;  %v2096_v16 = vpop.xlane.xlu0 %970 }
 0x354   : > { %1500 = vpow2.f32 %v938_v24  ;;  %vm741_vm8 = vcmp.ge.f32.partialorder %v2046_v31, %v732_v7  ;;  %v733_v5 = vsub.f32 %v2046_v31, %v732_v7  ;;  %v972_v2 = vsub.f32 %v2046_v31, %v2096_v16 }
 0x355   : > { %v742_v48 = vsel %vm741_vm8, %v2064_v41, 16  ;;  %1502 = vpow2.f32 %v763_v32  ;;  %vm1012_vm8 = vcmask 785408  }
 0x356   : > { %v743_v51 = vsel %vm729_vm7, %v742_v48, 2147483647  ;;  %1504 = vpow2.f32 %v798_v60  ;;  %v734_v37 = vmul.f32 1.442695, %v733_v5  ;;  %v973_v42 = vmul.f32 1.442695, %v972_v2 }
 0x357   : > { %v745_v50 = vshra.s32 %v743_v51, 16  ;;  %1506 = vpow2.f32 %v833_v34  ;;  %v776_v12 = vpop.permute.xlu0 %775  ;;  %v744_v19 = vand.u32 65535, %v743_v51  ;;  %v593_v2 = vld [vmem:[#allocation2 + $0x10] sm:$0xff] }
 0x358   : > { %1508 = vpow2.f32 %v868_v11  ;;  %v777_v43 = vsel %vm774_vm9, %v776_v12, 16 }
 0x359   : > { %v747_v26 = vcvt.s32.f32 %v745_v50  ;;  %1510 = vpow2.f32 %v903_v36  ;;  %v778_v45 = vsel %vm758_vm1, %v777_v43, 2147483647  ;;  %v746_v55 = vcvt.s32.f32 %v744_v19  ;;  %v591_v36 = vld [vmem:[#allocation2] sm:$0xff] }
 0x35a   : > { %1512 = vpow2.f32 %v734_v37  ;;  %v780_v47 = vshra.s32 %v778_v45, 16  ;;  %v779_v4 = vand.u32 65535, %v778_v45  ;;  %v1355_v12 = vpack.c.bf16 %v593_v2, %v591_v36  ;;  %v596_v37 = vld [vmem:[#allocation2 + $0x28] sm:$0xff]  ;;  %v595_v45 = vld [vmem:[#allocation2 + $0x20] sm:$0xff] }
 0x35b   : > { %748 = vmin.xlane.f32.xlu1 %v747_v26  ;;  %1514 = vpow2.f32 %v973_v42  ;;  %v598_v42 = vld [vmem:[#allocation2 + $0x38] sm:$0xff]  ;;  %v1689_v2 = vmov 0.0   ;;  %vm844_vm1 = vcmp.ge.f32.partialorder %v2046_v31, %v2068_v40 }
 0x35c   : > { %v782_v53 = vcvt.s32.f32 %v780_v47  ;;  %v781_v30 = vcvt.s32.f32 %v779_v4  ;;  %v1357_v43 = vpack.c.bf16 %v598_v42, %v596_v37  ;;  %v597_v47 = vld [vmem:[#allocation2 + $0x30] sm:$0xff]  ;;  %1080 = vmatprep.mubr.f32.mxu1 %v1689_v2 }
 0x35e   : > { %v2084_v58 = vpop.eup %1500 }
 0x35f   : > { %941 = vrot.lane.b32.xlu0 %v2084_v58, %s1683_s22  ;;  %v2098_v15 = vpop.eup %1502 }
 0x360   : > { %v2105_v13 = vpop.eup %1504 }
 0x361   : > { %v2110_v44 = vpop.eup %1506 }
 0x362   : > { %v2115_v46 = vpop.eup %1508 }
 0x363   : > { %v2119_v52 = vpop.eup %1510 }
 0x364   : > { %v1513_v14 = vpop.eup %1512 }
 0x365   : > { %v2123_v18 = vpop.eup %1514  ;;  %v736_v20 = vsel %vm729_vm7, %v1513_v14, 0.0 }
 0x36c   : > { %766 = vrot.lane.b32.xlu1 %v2098_v15, %s1684_s6 }
 0x370   : > { %801 = vrot.lane.b32.xlu1 %v2105_v13, %s1685_s26 }
 0x374   : > { %836 = vrot.lane.b32.xlu1 %v2110_v44, %s1686_s7 }
 0x378   : > { %871 = vrot.lane.b32.xlu1 %v2115_v46, %s1687_s8 }
 0x37c   : > { %906 = vrot.lane.b32.xlu1 %v2119_v52, %s1688_s21 }
 0x37e   : > { %783 = vmin.xlane.f32.xlu0 %v782_v53 }
 0x380   : > { %976 = vrot.lane.b32.xlu1 %v2123_v18, %s1682_s20  ;;  %s1690_s20 = smov [#allocation9]  }
 0x382   : > { %737 = vadd.xlane.f32.xlu0 %v736_v20  ;;  %v602_v20 = vld [vmem:[#allocation2 + $0x58] sm:$0xff] }
 0x3d1   : > { %v942_v28 = vpop.permute.xlu0 %941 }
 0x3e8   : > { %v2128_v54 = vpop.xlane.xlu1 %748 }
 0x3e9   : > { %vm750_vm10 = vcmp.eq.f32.partialorder %v747_v26, %v2128_v54 }
 0x3ea   : > { %v2131_v56 = vsel %vm750_vm10, %v746_v55, inf  ;;  %v599_v55 = vld [vmem:[#allocation2 + $0x40] sm:$0xff]  ;;  %vm914_vm10 = vcmp.ge.f32.partialorder %v2046_v31, %v2090_v33 }
 0x3ec   : > { %v767_v57 = vpop.permute.xlu1 %766 }
 0x3ed   : > { %v769_v62 = vsel %vm729_vm7, %v767_v57, 0.0  ;;  %v601_v57 = vld [vmem:[#allocation2 + $0x50] sm:$0xff] }
 0x3ee   : > { %770 = vadd.xlane.f32.xlu0 %v769_v62  ;;  %v1363_v62 = vpack.c.bf16 %v601_v57, %v599_v55 }
 0x3f0   : > { %v802_v63 = vpop.permute.xlu1 %801 }
 0x3f1   : > { %v804_v3 = vsel %vm729_vm7, %v802_v63, 0.0  ;;  %v604_v63 = vld [vmem:[#allocation2 + $0x68] sm:$0xff] }
 0x3f2   : > { %805 = vadd.xlane.f32.xlu0 %v804_v3  ;;  %v606_v3 = vld [vmem:[#allocation2 + $0x78] sm:$0xff] }
 0x3f3   : > { %v1365_v4 = vpack.c.bf16 %v606_v3, %v604_v63 }
 0x3f4   : > { %v837_v9 = vpop.permute.xlu1 %836 }
 0x3f5   : > { %v839_v60 = vsel %vm729_vm7, %v837_v9, 0.0 }
 0x3f8   : > { %v872_v17 = vpop.permute.xlu1 %871 }
 0x3f9   : > { %v874_v35 = vsel %vm729_vm7, %v872_v17, 0.0  ;;  %v608_v17 = vld [vmem:[#allocation2 + $0x88] sm:$0xff] }
 0x3fc   : > { %v907_v21 = vpop.permute.xlu1 %906 }
 0x3fd   : > { %v909_v11 = vsel %vm729_vm7, %v907_v21, 0.0  ;;  %v610_v21 = vld [vmem:[#allocation2 + $0x98] sm:$0xff] }
 0x400   : > { %v977_v22 = vpop.permute.xlu1 %976 }
 0x401   : > { %v979_v23 = vsel %vm729_vm7, %v977_v22, 0.0  ;;  %v1369_v22 = vpack.c.bf16 %v610_v21, %v608_v17 }
 0x408   : > { %810 = vrot.lane.b32.xlu0 %v2064_v41, %s1683_s22  ;;  %s1594_s22 = sshll.u32 %s1690_s20, 4  ;;  %s1595_s22 = int_to_ptr.vmem [resolvable:$false] %s1594_s22 }
 0x409   : > { %p1597_p0 = scmp.lt.s32.totalorder %s1131_s27, %s1595_s22 }
 0x40b   : > { %v2137_v29 = vpop.xlane.xlu0 %783 }
 0x40c   : > { %vm785_vm11 = vcmp.eq.f32.partialorder %v782_v53, %v2137_v29  ;;  %v1359_v53 = vpack.c.bf16 %v597_v47, %v595_v45 }
 0x40d   : > { %v2140_v6 = vsel %vm785_vm11, %v781_v30, inf  ;;  %v605_v30 = vld [vmem:[#allocation2 + $0x70] sm:$0xff]  ;;  %vm949_vm11 = vcmp.ge.f32.partialorder %v2046_v31, %v2072_v0 }
 0x40f   : > { %v738_v39 = vpop.xlane.xlu0 %737 }
 0x427   : > { %980 = vadd.xlane.f32.xlu0 %v979_v23  ;;  %v607_v23 = vld [vmem:[#allocation2 + $0x80] sm:$0xff] }
 0x43d   : > { %880 = vrot.lane.b32.xlu0 %v2064_v41, %s1687_s8 }
 0x47b   : > { %v771_v38 = vpop.xlane.xlu0 %770 }
 0x47c   : > { %1516 = vrcp.f32 %v771_v38 }
 0x47d   : > { %1518 = vrcp.f32 %v738_v39  ;;  %v609_v39 = vld [vmem:[#allocation2 + $0x90] sm:$0xff] }
 0x47e   : > { %v1371_v38 = vpack.c.bf16 %v609_v39, %v607_v23 }
 0x47f   : > { %v806_v8 = vpop.xlane.xlu0 %805 }
 0x480   : > { %1520 = vrcp.f32 %v806_v8  ;;  %v612_v8 = vld [vmem:[#allocation2 + $0xa8] sm:$0xff] }
 0x483   : > { %v811_v24 = vpop.permute.xlu0 %810 }
 0x484   : > { %v812_v7 = vsel %vm809_vm12, %v811_v24, 16  ;;  %v614_v24 = vld [vmem:[#allocation2 + $0xb8] sm:$0xff]  ;;  %vm984_vm12 = vcmp.ge.f32.partialorder %v2046_v31, %v2096_v16 }
 0x485   : > { %v2148_v49 = vsel %vm793_vm3, %v812_v7, 2147483647  ;;  %v1373_v7 = vpack.c.bf16 %v614_v24, %v612_v8  ;;  %vm1008_vm3 = vcmask 523264  }
 0x486   : > { %v1517_v48 = vpop.eup %1516  ;;  %v815_v51 = vshra.s32 %v2148_v49, 16  ;;  %v814_v47 = vand.u32 65535, %v2148_v49 }
 0x487   : > { %v1519_v50 = vpop.eup %1518  ;;  %v773_v25 = vmul.f32 %v1517_v48, %v2098_v15  ;;  %v594_v15 = vld [vmem:[#allocation2 + $0x18] sm:$0xff]  ;;  %v611_v48 = vld [vmem:[#allocation2 + $0xa0] sm:$0xff] }
 0x488   : > { %v2152_v26 = vcvt.s32.f32 %v815_v51  ;;  %v740_v59 = vmul.f32 %v1519_v50, %v1513_v14  ;;  %v1353_v5 = vpack.c.bf16 %v594_v15, %v592_v10  ;;  %v600_v14 = vld [vmem:[#allocation2 + $0x48] sm:$0xff]  ;;  %v613_v51 = vld [vmem:[#allocation2 + $0xb0] sm:$0xff]  ;;  %v619_v15 = vld [vmem:[#allocation2 + $0xe0] sm:$0xff] }
 0x489   : > { %v1361_v19 = vpack.c.bf16 %v602_v20, %v600_v14  ;;  %v1375_v50 = vpack.c.bf16 %v613_v51, %v611_v48  ;;  %v816_v14 = vcvt.s32.f32 %v814_v47 }
 0x48a   : > { %v1521_v32 = vpop.eup %1520  ;;  %818 = vmin.xlane.f32.xlu1 %v2152_v26  ;;  %v1003_v61 = vsel %vm729_vm7, %v740_v59, %v773_v25  ;;  %1354 = vmatprep.subr.bf16.mxu1 %v1353_v5  ;;  %v616_v25 = vld [vmem:[#allocation2 + $0xc8] sm:$0xff]  ;;  %v621_v5 = vld [vmem:[#allocation2 + $0xf0] sm:$0xff] }
 0x48b   : > { %v808_v27 = vmul.f32 %v1521_v32, %v2105_v13  ;;  %v944_v13 = vsel %vm729_vm7, %v942_v28, 0.0  ;;  %1356 = vmatpush1.bf16.msra.mxu1 %v1355_v12  ;;  %v603_v28 = vld [vmem:[#allocation2 + $0x60] sm:$0xff]  ;;  %v618_v32 = vld [vmem:[#allocation2 + $0xd8] sm:$0xff]  ;;  %v1383_v36 = vpack.c.bf16 %v621_v5, %v619_v15  ;;  %vm1010_vm7 = vcmask 654336  }
 0x48c   : > { %1358 = vmatprep.subr.bf16.mxu1 %v1357_v43  ;;  %v1367_v9 = vpack.c.bf16 %v605_v30, %v603_v28  ;;  %v1377_v59 = vpack.c.bf16 %v618_v32, %v616_v25 }
 0x48d   : > { %v2158_v34 = vsel %vm1004_vm13, %v1003_v61, %v808_v27  ;;  %v615_v27 = vld [vmem:[#allocation2 + $0xc0] sm:$0xff]  ;;  %v617_v61 = vld [vmem:[#allocation2 + $0xd0] sm:$0xff]  ;;  %vm1091_vm13 = vcmask 15360  }
 0x48e   : > { %840 = vadd.xlane.f32.xlu1 %v839_v60  ;;  %v1379_v60 = vpack.c.bf16 %v617_v61, %v615_v27 }
 0x48f   : > { %1360 = vmatpush1.bf16.msra.mxu1 %v1359_v53 }
 0x490   : > { %1362 = vmatprep.subr.bf16.mxu1 %v1361_v19 }
 0x492   : > { %875 = vadd.xlane.f32.xlu1 %v874_v35  ;;  %v620_v35 = vld [vmem:[#allocation2 + $0xe8] sm:$0xff] }
 0x493   : > { %1364 = vmatpush1.bf16.msra.mxu1 %v1363_v62 }
 0x494   : > { %1366 = vmatprep.subr.bf16.mxu1 %v1365_v4 }
 0x496   : > { %910 = vadd.xlane.f32.xlu1 %v909_v11  ;;  %v622_v11 = vld [vmem:[#allocation2 + $0xf8] sm:$0xff] }
 0x497   : > { %1368 = vmatpush1.bf16.msra.mxu1 %v1367_v9  ;;  %v1381_v10 = vpack.c.bf16 %v622_v11, %v620_v35 }
 0x498   : > { %1370 = vmatprep.subr.bf16.mxu1 %v1369_v22 }
 0x49a   : > { %945 = vadd.xlane.f32.xlu1 %v944_v13 }
 0x49b   : > { %1372 = vmatpush1.bf16.msra.mxu1 %v1371_v38 }
 0x49c   : > { %1374 = vmatprep.subr.bf16.mxu1 %v1373_v7 }
 0x49f   : > { %1376 = vmatpush1.bf16.msra.mxu1 %v1375_v50 }
 0x4a0   : > { %1378 = vmatprep.subr.bf16.mxu1 %v1377_v59 }
 0x4a3   : > { %1380 = vmatpush1.bf16.msra.mxu1 %v1379_v60 }
 0x4a4   : > { %1382 = vmatprep.subr.bf16.mxu1 %v1381_v10 }
 0x4a7   : > { %1384 = vmatpush1.bf16.msra.mxu1 %v1383_v36 }
 0x4ab   : > { %845 = vrot.lane.b32.xlu1 %v2064_v41, %s1688_s21 }
 0x4b4   : > { %v981_v12 = vpop.xlane.xlu0 %980 }
 0x4b8   : > { %v881_v13 = vpop.permute.xlu0 %880 }
 0x4b9   : > { %v882_v37 = vsel %vm879_vm14, %v881_v13, 16  ;;  %v755_v13 = vcvt.f32.s32 %v2128_v54  ;;  %vm1093_vm14 = vcmask 23552  }
 0x4ba   : > { %v883_v42 = vsel %vm863_vm2, %v882_v37, 2147483647  ;;  %vm1006_vm2 = vcmask 392192   ;;  %v790_v37 = vcvt.f32.s32 %v2137_v29 }
 0x4bb   : > { %v885_v43 = vshra.s32 %v883_v42, 16 }
 0x4bd   : > { %v887_v45 = vcvt.s32.f32 %v885_v43 }
 0x4bf   : > { %888 = vmin.xlane.f32.xlu0 %v887_v45 }
 0x517   : > { %v2169_v53 = vpop.xlane.xlu1 %818 }
 0x518   : > { %vm820_vm15 = vcmp.eq.f32.partialorder %v2152_v26, %v2169_v53  ;;  %v825_v43 = vcvt.f32.s32 %v2169_v53 }
 0x519   : > { %v821_v20 = vsel %vm820_vm15, %v816_v14, inf }
 0x51b   : > { %v841_v19 = vpop.xlane.xlu1 %840 }
 0x51c   : > { %1522 = vrcp.f32 %v841_v19  ;;  %v756_v19 = vshll.u32 %v755_v13, 16 }
 0x51f   : > { %v876_v55 = vpop.xlane.xlu1 %875 }
 0x520   : > { %1524 = vrcp.f32 %v876_v55  ;;  %v791_v55 = vshll.u32 %v790_v37, 16 }
 0x523   : > { %v911_v1 = vpop.xlane.xlu1 %910 }
 0x524   : > { %1526 = vrcp.f32 %v911_v1 }
 0x525   : > { %1528 = vrcp.f32 %v981_v12 }
 0x526   : > { %v1523_v62 = vpop.eup %1522 }
 0x527   : > { %v946_v57 = vpop.xlane.xlu1 %945  ;;  %v843_v28 = vmul.f32 %v1523_v62, %v2110_v44  ;;  %v826_v62 = vshll.u32 %v825_v43, 16 }
 0x528   : > { %1530 = vrcp.f32 %v946_v57 }
 0x529   : > { %v1007_v40 = vsel %vm1006_vm2, %v2158_v34, %v843_v28 }
 0x52a   : > { %v1525_v63 = vpop.eup %1524 }
 0x52b   : > { %v846_v49 = vpop.permute.xlu1 %845  ;;  %v878_v9 = vmul.f32 %v1525_v63, %v2115_v46 }
 0x52c   : > { %v847_v3 = vsel %vm844_vm1, %v846_v49, 16 }
 0x52d   : > { %v848_v4 = vsel %vm828_vm0, %v847_v3, 2147483647  ;;  %v1009_v38 = vsel %vm1008_vm3, %v1007_v40, %v878_v9  ;;  %vm1014_vm0 = vcmask 916480  }
 0x52e   : > { %v1527_v26 = vpop.eup %1526  ;;  %v850_v30 = vshra.s32 %v848_v4, 16  ;;  %v849_v59 = vand.u32 65535, %v848_v4 }
 0x52f   : > { %v913_v21 = vmul.f32 %v1527_v26, %v2119_v52  ;;  %v1529_v22 = vpop.eup %1528 }
 0x530   : > { %v852_v17 = vcvt.s32.f32 %v850_v30  ;;  %v983_v44 = vmul.f32 %v1529_v22, %v2123_v18  ;;  %v851_v60 = vcvt.s32.f32 %v849_v59 }
 0x531   : > { %v1011_v8 = vsel %vm1010_vm7, %v1009_v38, %v913_v21 }
 0x532   : > { %v1531_v23 = vpop.eup %1530  ;;  %853 = vmin.xlane.f32.xlu1 %v852_v17 }
 0x533   : > { %v948_v39 = vmul.f32 %v1531_v23, %v2084_v58  ;;  %v884_v58 = vand.u32 65535, %v883_v42 }
 0x535   : > { %v1013_v46 = vsel %vm1012_vm8, %v1011_v8, %v948_v39  ;;  %v886_v18 = vcvt.s32.f32 %v884_v58 }
 0x536   : > { %v1015_v24 = vsel %vm1014_vm0, %v1013_v46, %v983_v44 }
 0x537   : > { %1081 = vmatmul.mubr.f32.vlgmr.msra.gmra.mrb[0].mxu1 %v1015_v24 }
 0x543   : > { %915 = vrot.lane.b32.xlu1 %v2064_v41, %s1686_s7 }
 0x547   : > { %950 = vrot.lane.b32.xlu1 %v2064_v41, %s1685_s26 }
 0x54b   : > { %985 = vrot.lane.b32.xlu1 %v2064_v41, %s1684_s6  ;;  %s1596_s6 = scalar_lea.vmem %s1595_s22, 512 }
 0x54c   : > { %v2189_v52 = vpop.xlane.xlu0 %888  ;;  %p1598_p5 = scmp.lt.s32.totalorder %s1596_s6, %s1590_s11 }
 0x54d   : > { %vm890_vm9 = vcmp.eq.f32.partialorder %v887_v45, %v2189_v52 }
 0x54e   : > { %v891_v34 = vsel %vm890_vm9, %v886_v18, inf  ;;  %p1599_p9 = por %p1598_p5, %p1597_p0 }
 0x550   : > { %p1600_p1 = pnand %p1599_p9, %p1593_p11 }
 0x56f   : > { %787 = vmin.xlane.f32.xlu1 %v2140_v6 }
 0x573   : > { %822 = vmin.xlane.f32.xlu1 %v821_v20 }
 0x577   : > { %892 = vmin.xlane.f32.xlu1 %v891_v34 }
 0x5bf   : > { %v854_v7 = vpop.xlane.xlu1 %853 }
 0x5c0   : > { %v860_v1 = vcvt.f32.s32 %v854_v7 }
 0x5c2   : > { %v861_v4 = vshll.u32 %v860_v1, 16 }
 0x5c3   : > { %v916_v48 = vpop.permute.xlu1 %915 }
 0x5c4   : > { %v917_v51 = vsel %vm914_vm10, %v916_v48, 16 }
 0x5c5   : > { %v918_v50 = vsel %vm898_vm5, %v917_v51, 2147483647  ;;  %vm855_vm5 = vcmp.eq.f32.partialorder %v852_v17, %v854_v7 }
 0x5c6   : > { %v920_v41 = vshra.s32 %v918_v50, 16  ;;  %v856_v0 = vsel %vm855_vm5, %v851_v60, inf  ;;  %v919_v16 = vand.u32 65535, %v918_v50 }
 0x5c7   : > { %v951_v25 = vpop.permute.xlu1 %950 }
 0x5c8   : > { %v922_v6 = vcvt.s32.f32 %v920_v41  ;;  %v952_v32 = vsel %vm949_vm11, %v951_v25, 16 }
 0x5c9   : > { %v953_v61 = vsel %vm933_vm4, %v952_v32, 2147483647 }
 0x5ca   : > { %923 = vmin.xlane.f32.xlu0 %v922_v6  ;;  %v955_v35 = vshra.s32 %v953_v61, 16  ;;  %v954_v29 = vand.u32 65535, %v953_v61 }
 0x5cb   : > { %v986_v27 = vpop.permute.xlu1 %985 }
 0x5cc   : > { %v987_v33 = vsel %vm984_vm12, %v986_v27, 16  ;;  %v957_v10 = vcvt.s32.f32 %v955_v35  ;;  %v956_v21 = vcvt.s32.f32 %v954_v29 }
 0x5cd   : > { %v988_v11 = vsel %vm968_vm6, %v987_v33, 2147483647  ;;  %vm1089_vm6 = vcmask 7168  }
 0x5ce   : > { %752 = vmin.xlane.f32.xlu0 %v2131_v56  ;;  %v990_v15 = vshra.s32 %v988_v11, 16  ;;  %v921_v56 = vcvt.s32.f32 %v919_v16  ;;  %v989_v9 = vand.u32 65535, %v988_v11 }
 0x5d0   : > { %v992_v5 = vcvt.s32.f32 %v990_v15  ;;  %v991_v39 = vcvt.s32.f32 %v989_v9 }
 0x5d2   : > { %857 = vmin.xlane.f32.xlu0 %v856_v0 }
 0x5d6   : > { %958 = vmin.xlane.f32.xlu0 %v957_v10 }
 0x5da   : > { %993 = vmin.xlane.f32.xlu0 %v992_v5 }
 0x5fc   : > { %v788_v31 = vpop.xlane.xlu1 %787 }
 0x5fd   : > { %v789_v47 = vcvt.f32.s32 %v788_v31 }
 0x5ff   : > { %v792_v49 = vadd.s32 %v791_v55, %v789_v47 }
 0x600   : > { %v823_v42 = vpop.xlane.xlu1 %822 }
 0x601   : > { %v824_v14 = vcvt.f32.s32 %v823_v42 }
 0x603   : > { %v827_v63 = vadd.s32 %v826_v62, %v824_v14 }
 0x60a   : > { %v1082_v36 = vpop.f32.mrb[0].mxu1 }
 0x60b   : > { %1087 = vst [vmem:[%s1881_s29] sm:$0xff] %v1082_v36  ;;  %v1084_v2 = vpop.f32.mrb[1].mxu1 }
 0x60c   : > { %1088 = vst [vmem:[%s1881_s29 + $0x8] sm:$0xff] %v1084_v2 }
 0x657   : > { %v2204_v12 = vpop.xlane.xlu0 %923 }
 0x658   : > { %vm925_vm4 = vcmp.eq.f32.partialorder %v922_v6, %v2204_v12 }
 0x659   : > { %v926_v45 = vsel %vm925_vm4, %v921_v56, inf }
 0x65a   : > { %927 = vmin.xlane.f32.xlu1 %v926_v45 }
 0x65b   : > { %v753_v20 = vpop.xlane.xlu0 %752 }
 0x65c   : > { %v754_v57 = vcvt.f32.s32 %v753_v20 }
 0x65e   : > { %v757_v54 = vadd.s32 %v756_v19, %v754_v57 }
 0x65f   : > { %v858_v3 = vpop.xlane.xlu0 %857 }
 0x660   : > { %v1090_v26 = vsel %vm1089_vm6, %v757_v54, %v792_v49  ;;  %v859_v53 = vcvt.f32.s32 %v858_v3 }
 0x661   : > { %v1092_v28 = vsel %vm1091_vm13, %v1090_v26, %v827_v63 }
 0x662   : > { %v862_v30 = vadd.s32 %v861_v4, %v859_v53 }
 0x663   : > { %v959_v17 = vpop.xlane.xlu0 %958 }
 0x664   : > { %v1094_v22 = vsel %vm1093_vm14, %v1092_v28, %v862_v30  ;;  %vm960_vm15 = vcmp.eq.f32.partialorder %v957_v10, %v959_v17 }
 0x665   : > { %v961_v23 = vsel %vm960_vm15, %v956_v21, inf }
 0x666   : > { %962 = vmin.xlane.f32.xlu0 %v961_v23 }
 0x667   : > { %v994_v40 = vpop.xlane.xlu0 %993 }
 0x668   : > { %vm995_vm1 = vcmp.eq.f32.partialorder %v992_v5, %v994_v40 }
 0x669   : > { %v996_v38 = vsel %vm995_vm1, %v991_v39, inf }
 0x66a   : > { %997 = vmin.xlane.f32.xlu0 %v996_v38 }
 0x66b   : > { %1603 = shalt.err (!%p1600_p1)
}
 0x66c   : > { %s1604_s15 = scalar_lea.hbm %s2215_s9, 256  ;;  %s1608_s26 = scalar_lea.hbm %s2263_s2, 512 }
 0x66d   : > { %p1605_p2 = scmp.ne.s32.totalorder %s2215_s9, %s1604_s15  ;;  %p1609_p13 = scmp.lt.u32.totalorder %s2215_s9, %s2263_s2 }
 0x66e   : > { %p1610_p4 = scmp.lt.u32.totalorder %s1608_s26, %s1604_s15  ;;  %p1612_p8 = scmp.lt.u32.totalorder %s1604_s15, %s2215_s9 }
 0x66f   : > { %p1606_p7 = pnand %p1605_p2, %p1807_p10 }
 0x670   : > { %p1611_p6 = por %p1610_p4, %p1609_p13 }
 0x671   : > { %p1607_p3 = pneg %p1606_p7 }
 0x672   : > { %p1613_p12 = por %p1612_p8, %p1611_p6 }
 0x674   : > { %p1614_p11 = pnand %p1613_p12, %p1607_p3 }
 0x676   : > { %1617 = shalt.err (!%p1614_p11)
}
 0x677   : > { %1391 = dma.vmem_to_hbm [thread:$0]  (%p1807_p10), %s1131_s27, 256, %s2215_s9, %s1106_s10   ;;  %v893_v44 = vpop.xlane.xlu1 %892  ;;  %v895_v8 = vcvt.f32.s32 %v2189_v52  ;;  %v930_v46 = vcvt.f32.s32 %v2204_v12  ;;  %vm1095_vm2 = vcmask 31744   ;;  %vm1097_vm3 = vcmask 39936  }
 0x678   : > { %v894_v24 = vcvt.f32.s32 %v893_v44  ;;  %v965_v25 = vcvt.f32.s32 %v959_v17  ;;  %v1000_v59 = vcvt.f32.s32 %v994_v40  ;;  %vm1099_vm7 = vcmask 48128  }
 0x679   : > { %v896_v58 = vshll.u32 %v895_v8, 16  ;;  %v931_v34 = vshll.u32 %v930_v46, 16  ;;  %vm1101_vm8 = vcmask 56320   ;;  %vm1103_vm0 = vcmask 64512  }
 0x67a   : > { %v966_v32 = vshll.u32 %v965_v25, 16  ;;  %v1001_v33 = vshll.u32 %v1000_v59, 16 }
 0x67b   : > { %v897_v48 = vadd.s32 %v896_v58, %v894_v24 }
 0x67d   : > { %v1096_v50 = vsel %vm1095_vm2, %v1094_v22, %v897_v48 }
 0x6e7   : > { %v928_v18 = vpop.xlane.xlu1 %927 }
 0x6e8   : > { %v929_v7 = vcvt.f32.s32 %v928_v18 }
 0x6ea   : > { %v932_v51 = vadd.s32 %v931_v34, %v929_v7 }
 0x6ec   : > { %v1098_v41 = vsel %vm1097_vm3, %v1096_v50, %v932_v51 }
 0x6f3   : > { %v963_v6 = vpop.xlane.xlu0 %962 }
 0x6f4   : > { %v964_v27 = vcvt.f32.s32 %v963_v6 }
 0x6f6   : > { %v967_v52 = vadd.s32 %v966_v32, %v964_v27 }
 0x6f7   : > { %v998_v61 = vpop.xlane.xlu0 %997 }
 0x6f8   : > { %v1100_v60 = vsel %vm1099_vm7, %v1098_v41, %v967_v52  ;;  %v999_v35 = vcvt.f32.s32 %v998_v61 }
 0x6fa   : > { %v1002_v11 = vadd.s32 %v1001_v33, %v999_v35 }
 0x6fc   : > { %v1102_v0 = vsel %vm1101_vm8, %v1100_v60, %v1002_v11 }
 0x6fd   : > { %1104 = vst.msk [vmem:[%s1879_s18] sm:$0xff] %vm1103_vm0, %v1102_v0 }
 0x6fe PF: > { %s1145_s30 = sand.u32 1, %s1656_s12   ;;  %p2282_p10 = scmp.ne.s32.totalorder %s2272_s23, 0 }
 0x6ff   : > { %p2283_p0 = scmp.ge.s32.totalorder %s1676_s17, 2  ;;  %s1146_s21 = scalar_lea.sflag [#allocation6], %s1145_s30 }
 0x701   : > { %p1402_p5 = pnand %p2283_p0, %p2282_p10 }
 0x703   : > { %1651 = dma.done.wait (!%p1402_p5), %s1146_s21, 256  }
 0x704   : > { %1653 = vsyncadd (!%p1402_p5), %s1146_s21, 4294967040  ;;  %s21_s17 = sadd.s32 1, %s1676_s17   ;;  %s2284_s12 = smov %s1660_s13 }
 0x705   : > { %p18_p9 = scmp.ge.s32.totalorder %s21_s17, 4   ;;  %s2285_s13 = smov %s1664_s14 }
 0x706   : > { %s2286_s14 = smov %s1816_s5  ;;  %s2287_s15 = smov %s1672_s16 }
 0x707   : > { %s2288_s16 = smov %s2290_s28  ;;  %20 = sbr.rel (!%p18_p9) target bundleno = 7 (0x7), region = 94 }
 0x70e   :  { %1162 = vsyncpa [#allocation5], 1 }
 0x70f   :  { %1164 = vsyncpa [#allocation5 + $0x1], 1 }
 0x710   :  { %1165 = vsyncpa [#allocation8], 1 }
 0x711   :  { %1166 = vsyncpa [#allocation6], 1 }
 0x712   :  { %1168 = vsyncpa [#allocation6 + $0x1], 1 }

</bundles_post_ra>
